<compile_context>
chip_gen: v6e
topology: v6e:2x2x1
jax: 0.10.0
libtpu: 0.0.40
codegen_flags: <defaults>
</compile_context>

<pallas_src>
import functools

import jax
import jax.numpy as jnp
from jax.experimental import pallas as pl
from jax.experimental.pallas import tpu as pltpu


# ---------------------------------------------------------------------------
# helpers
# ---------------------------------------------------------------------------
def _round_up(x, m):
    return (x + m - 1) // m * m


def _pick(d, prefs):
    for t in prefs:
        if d % t == 0:
            return t
    return d


# ---------------------------------------------------------------------------
# Generic fused kernel: out = relu?((x @ w_scaled) + bias (+ residual))
#   x bf16 (M,K), w bf16 (K,C) with BN scale pre-folded, bias f32 (1,C)
# ---------------------------------------------------------------------------
def _make_matmul_kernel(apply_relu: bool, add_residual: bool):
    def kernel(x_ref, w_ref, b_ref, *rest):
        if add_residual:
            r_ref, o_ref, acc_ref = rest
        else:
            o_ref, acc_ref = rest
        k = pl.program_id(2)

        @pl.when(k == 0)
        def _init():
            acc_ref[...] = jnp.zeros_like(acc_ref)

        acc_ref[...] += jnp.dot(x_ref[...], w_ref[...],
                                preferred_element_type=jnp.float32)

        @pl.when(k == pl.num_programs(2) - 1)
        def _finalize():
            out = acc_ref[...] + b_ref[...]
            if add_residual:
                out = out + r_ref[...].astype(jnp.float32)
            if apply_relu:
                out = jnp.maximum(out, 0.0)
            o_ref[...] = out.astype(o_ref.dtype)

    return kernel


def fused_matmul_bn(x2d, w2d, bias, *, residual=None, relu=True,
                    out_dtype=jnp.bfloat16):
    """Conv-as-matmul + folded BN bias (+ residual) (+ ReLU) via pallas_call."""
    M, K = x2d.shape
    K2, C = w2d.shape
    assert K == K2 and K % 128 == 0 and C % 128 == 0

    # Row tiling: large lane/sublane-aligned tiles, padded M, cdiv-free grid.
    if M < 256:
        tm = _round_up(M, 8)
        Mp = tm
    else:
        Mp = _round_up(M, 256)
        tm = 512 if Mp % 512 == 0 else 256
    tn = _pick(C, (256, 128))
    tk = _pick(K, (512, 256, 128))

    if Mp != M:
        x2d = jnp.pad(x2d, ((0, Mp - M), (0, 0)))
        if residual is not None:
            residual = jnp.pad(residual, ((0, Mp - M), (0, 0)))

    grid = (Mp // tm, C // tn, K // tk)

    in_specs = [
        pl.BlockSpec((tm, tk), lambda i, j, k: (i, k)),   # activations
        pl.BlockSpec((tk, tn), lambda i, j, k: (k, j)),   # scale-folded weight
        pl.BlockSpec((1, tn), lambda i, j, k: (0, j)),    # folded BN bias
    ]
    args = [x2d, w2d, bias]
    if residual is not None:
        in_specs.append(pl.BlockSpec((tm, tn), lambda i, j, k: (i, j)))
        args.append(residual)

    kernel = _make_matmul_kernel(relu, residual is not None)
    out = pl.pallas_call(
        kernel,
        out_shape=jax.ShapeDtypeStruct((Mp, C), out_dtype),
        grid_spec=pltpu.PrefetchScalarGridSpec(
            num_scalar_prefetch=0,
            grid=grid,
            in_specs=in_specs,
            out_specs=pl.BlockSpec((tm, tn), lambda i, j, k: (i, j)),
            scratch_shapes=[pltpu.VMEM((tm, tn), jnp.float32)],
        ),
        compiler_params=pltpu.CompilerParams(
            dimension_semantics=("parallel", "parallel", "arbitrary"),
            vmem_limit_bytes=64 * 1024 * 1024,
        ),
    )(*args)
    return out[:M] if Mp != M else out


# ---------------------------------------------------------------------------
# 3x3 conv (stride s, padding 1) + folded BN + ReLU, tap-fused (no im2col blow-up)
#   h (N,H,W,C) bf16; w9 (9, C, Cout) bf16, tap order ky*3+kx, BN scale folded;
#   bias (1, Cout) f32. Returns (N, Ho, Wo, Cout) bf16.
# ---------------------------------------------------------------------------
def conv3x3_bn_relu(h, w9, bias, stride):
    N, H, W, C = h.shape
    Cout = w9.shape[2]
    s = stride
    Ho = (H + 2 - 3) // s + 1
    Wo = (W + 2 - 3) // s + 1
    dmax = 2 // s                 # max intra-phase unit shift of a tap
    Hph = Ho + dmax + 1           # +1 row so the flat over-read slices stay in bounds
    Wph = Wo + dmax
    L = Ho * Wph                  # per-image rows processed (Wph-Wo junk cols per row)

    # Conv zero-padding (1 on top/left) plus enough bottom/right so every stride
    # phase is exactly (Hph, Wph); the extra zeros are never read by valid outputs.
    hpad = jnp.pad(h, ((0, 0), (1, s * Hph - H - 1), (1, s * Wph - W - 1), (0, 0)))
    # Stride-phase decomposition: total size == |hpad| (single materialization).
    phases = jnp.stack([hpad[:, py::s, px::s, :]
                        for py in range(s) for px in range(s)], axis=1)
    phases = phases.reshape(N, s * s * Hph * Wph, C)

    tn = _pick(Cout, (256, 128))
    grid = (N, Cout // tn)

    def kernel(ph_ref, w_ref, b_ref, o_ref):
        acc = jnp.zeros((L, tn), jnp.float32)
        for ky in range(3):
            for kx in range(3):
                p = (ky % s) * s + (kx % s)
                start = p * Hph * Wph + (ky // s) * Wph + (kx // s)
                tap = ph_ref[0, pl.ds(start, L), :]          # (L, C) bf16, unit stride
                acc = acc + jnp.dot(tap, w_ref[ky * 3 + kx],
                                    preferred_element_type=jnp.float32)
        o_ref[0] = jnp.maximum(acc + b_ref[...], 0.0).astype(o_ref.dtype)

    out = pl.pallas_call(
        kernel,
        out_shape=jax.ShapeDtypeStruct((N, L, Cout), jnp.bfloat16),
        grid_spec=pltpu.PrefetchScalarGridSpec(
            num_scalar_prefetch=0,
            grid=grid,
            in_specs=[
                pl.BlockSpec((1, s * s * Hph * Wph, C), lambda n, j: (n, 0, 0)),
                pl.BlockSpec((9, C, tn), lambda n, j: (0, 0, j)),
                pl.BlockSpec((1, tn), lambda n, j: (0, j)),
            ],
            out_specs=pl.BlockSpec((1, L, tn), lambda n, j: (n, 0, j)),
        ),
        compiler_params=pltpu.CompilerParams(
            dimension_semantics=("parallel", "parallel"),
            vmem_limit_bytes=64 * 1024 * 1024,
        ),
    )(phases, w9, bias)
    # each image's rows are laid out (Ho, Wph); drop the junk columns
    return out.reshape(N, Ho, Wph, Cout)[:, :, :Wo, :]


# ---------------------------------------------------------------------------
# Parameter setup: PyTorch-shaped init, BN folding into weights, channel padding
# to multiples of 128 (lane-dense), bf16 weights.
# ---------------------------------------------------------------------------
def init_params(key, in_channels, out_channels, stride, reduction=4):
    cb = out_channels // reduction
    cin_p, cb_p, cout_p = (_round_up(c, 128) for c in (in_channels, cb, out_channels))
    ks = jax.random.split(key, 8)

    def conv_w(k, cout, cin, ksz):
        return 0.1 * jax.random.normal(k, (cout, cin, ksz, ksz), jnp.float32)

    def bn(k, c, eps=1e-5):
        k1, k2, k3, k4 = jax.random.split(k, 4)
        gamma = 1.0 + 0.1 * jax.random.normal(k1, (c,), jnp.float32)
        beta = 0.1 * jax.random.normal(k2, (c,), jnp.float32)
        mean = 0.1 * jax.random.normal(k3, (c,), jnp.float32)
        var = 0.5 + jnp.abs(jax.random.normal(k4, (c,), jnp.float32))
        scale = gamma / jnp.sqrt(var + eps)
        bias = beta - mean * scale
        return scale, bias

    def pad2(w, r, c):
        return jnp.pad(w, ((0, r - w.shape[0]), (0, c - w.shape[1])))

    def padb(b, c):
        return jnp.pad(b, (0, c - b.shape[0])).reshape(1, c).astype(jnp.float32)

    p = {}
    # conv1: 1x1, Cin -> Cb, BN, ReLU
    w1 = conv_w(ks[0], cb, in_channels, 1)[:, :, 0, 0].T        # (Cin, Cb)
    s1, b1 = bn(ks[1], cb)
    p["w1"] = pad2(w1 * s1[None, :], cin_p, cb_p).astype(jnp.bfloat16)
    p["b1"] = padb(b1, cb_p)
    # conv2: 3x3, Cb -> Cb, BN, ReLU; tap-major (9, Cb_p, Cb_p)
    w2 = conv_w(ks[2], cb, cb, 3)
    s2, b2 = bn(ks[3], cb)
    w2 = jnp.transpose(w2, (2, 3, 1, 0)).reshape(9, cb, cb) * s2[None, None, :]
    p["w2"] = jnp.pad(w2, ((0, 0), (0, cb_p - cb), (0, cb_p - cb))).astype(jnp.bfloat16)
    p["b2"] = padb(b2, cb_p)
    # conv3: 1x1, Cb -> Cout, BN (no ReLU before residual add)
    w3 = conv_w(ks[4], out_channels, cb, 1)[:, :, 0, 0].T
    s3, b3 = bn(ks[5], out_channels)
    p["w3"] = pad2(w3 * s3[None, :], cb_p, cout_p).astype(jnp.bfloat16)
    p["b3"] = padb(b3, cout_p)
    # residual projection: 1x1 strided conv + BN
    if in_channels != out_channels or stride != 1:
        wr = conv_w(ks[6], out_channels, in_channels, 1)[:, :, 0, 0].T
        sr, br = bn(ks[7], out_channels)
        p["wr"] = pad2(wr * sr[None, :], cin_p, cout_p).astype(jnp.bfloat16)
        p["br"] = padb(br, cout_p)
    return p


# ---------------------------------------------------------------------------
# Forward pass (matches ResNetBottleNetLayer.forward, inference-mode BN)
# ---------------------------------------------------------------------------
def resnet_bottleneck_forward(x_nchw, params, *, in_channels, out_channels, stride=1):
    x = jnp.transpose(x_nchw, (0, 2, 3, 1))                     # NCHW -> NHWC
    N, H, W, _ = x.shape
    cin_p = params["w1"].shape[0]
    cb_p = params["w1"].shape[1]
    cout_p = params["w3"].shape[1]
    x = jnp.pad(x, ((0, 0), (0, 0), (0, 0), (0, cin_p - in_channels)))
    x = x.astype(jnp.bfloat16)

    # --- bottleneck conv 1: 1x1, BN, ReLU ---
    h = fused_matmul_bn(x.reshape(N * H * W, cin_p), params["w1"], params["b1"],
                        relu=True, out_dtype=jnp.bfloat16)
    h = h.reshape(N, H, W, cb_p)

    # --- bottleneck conv 2: 3x3, stride, pad=1, BN, ReLU (tap-fused kernel) ---
    h2 = conv3x3_bn_relu(h, params["w2"], params["b2"], stride)
    _, Ho, Wo, _ = h2.shape

    # --- residual branch: 1x1 strided conv + BN (or identity) ---
    if "wr" in params:
        xr = x[:, ::stride, ::stride, :].reshape(N * Ho * Wo, cin_p)
        r = fused_matmul_bn(xr, params["wr"], params["br"], relu=False,
                            out_dtype=jnp.bfloat16)
    else:
        r = x.reshape(N * H * W, cin_p)        # identity (cin_p == cout_p here)

    # --- bottleneck conv 3: 1x1, BN, + residual, final ReLU (all fused) ---
    out = fused_matmul_bn(h2.reshape(N * Ho * Wo, cb_p), params["w3"], params["b3"],
                          residual=r, relu=True, out_dtype=jnp.float32)
    out = out.reshape(N, Ho, Wo, cout_p)[..., :out_channels]
    return jnp.transpose(out, (0, 3, 1, 2))                     # NHWC -> NCHW


# ---------------------------------------------------------------------------
if __name__ == "__main__":
    key = jax.random.PRNGKey(0)
    kx, kp = jax.random.split(key)

    N, Cin, H, W = 2, 8, 16, 16
    Cout, stride, reduction = 16, 2, 4

    x = jax.random.normal(kx, (N, Cin, H, W), jnp.float32)
    params = init_params(kp, Cin, Cout, stride, reduction)

    fwd = jax.jit(functools.partial(resnet_bottleneck_forward,
                                    in_channels=Cin, out_channels=Cout,
                                    stride=stride))
    out = jax.block_until_ready(fwd(x, params))
    assert out.shape == (N, Cout, H // stride, W // stride), out.shape
    assert bool(jnp.all(out >= 0.0))  # final ReLU
    print("KERNEL_OK")
</pallas_src>

<mosaic_0001>
module attributes {stable_mosaic.version = 11 : i64} {
  func.func @kernel(%arg0: i32, %arg1: i32, %arg2: i32, %arg3: memref<512x128xbf16, #tpu.memory_space<vmem>>, %arg4: memref<128x128xbf16, #tpu.memory_space<vmem>>, %arg5: memref<1x128xf32, #tpu.memory_space<vmem>>, %arg6: memref<512x128xbf16, #tpu.memory_space<vmem>>, %arg7: memref<512x128xf32, #tpu.memory_space<vmem>>) attributes {dimension_semantics = [#tpu.dimension_semantics<parallel>, #tpu.dimension_semantics<parallel>, #tpu.dimension_semantics<arbitrary>], iteration_bounds = array<i64: 1, 1, 1>, scalar_prefetch = 0 : i64, scratch_operands = 1 : i64, tpu.core_type = #tpu.core_type<tc>, window_params = [{transform_indices = @transform_0, window_bounds = array<i64: 512, 128>}, {transform_indices = @transform_1, window_bounds = array<i64: 128, 128>}, {transform_indices = @transform_2, window_bounds = array<i64: 1, 128>}, {transform_indices = @transform_3, window_bounds = array<i64: 512, 128>}]} {
    %c0_i32 = arith.constant 0 : i32
    %0 = arith.cmpi eq, %arg2, %c0_i32 : i32
    %1 = arith.extui %0 : i1 to i32
    %c0_i32_0 = arith.constant 0 : i32
    %2 = arith.cmpi ne, %1, %c0_i32_0 : i32
    scf.if %2 {
      %cst_10 = arith.constant 0.000000e+00 : f32
      %12 = vector.broadcast %cst_10 : f32 to vector<512x128xf32>
      %c0_11 = arith.constant 0 : index
      %c0_12 = arith.constant 0 : index
      %13 = vector.load %arg7[%c0_11, %c0_12] : memref<512x128xf32, #tpu.memory_space<vmem>>, vector<512x128xf32>
      tpu.vector_store %arg7[%c0_11, %c0_12], %12 {strides = array<i32>} : memref<512x128xf32, #tpu.memory_space<vmem>>, vector<512x128xf32>,
    } else {
    }
    %c0 = arith.constant 0 : index
    %c0_1 = arith.constant 0 : index
    %3 = vector.load %arg7[%c0, %c0_1] : memref<512x128xf32, #tpu.memory_space<vmem>>, vector<512x128xf32>
    %c0_2 = arith.constant 0 : index
    %c0_3 = arith.constant 0 : index
    %4 = vector.load %arg3[%c0_2, %c0_3] : memref<512x128xbf16, #tpu.memory_space<vmem>>, vector<512x128xbf16>
    %c0_4 = arith.constant 0 : index
    %c0_5 = arith.constant 0 : index
    %5 = vector.load %arg4[%c0_4, %c0_5] : memref<128x128xbf16, #tpu.memory_space<vmem>>, vector<128x128xbf16>
    %cst = arith.constant dense<0.000000e+00> : vector<512x128xf32>
    %6 = tpu.matmul %4, %5, %cst {dimension_numbers = #tpu.dot_dimension_numbers<[1], [0], [0], [1], [0, 0, 1, 1], [], []>} : vector<512x128xbf16>, vector<128x128xbf16>, vector<512x128xf32> -> vector<512x128xf32>
    %7 = arith.addf %3, %6 : vector<512x128xf32>
    %c0_6 = arith.constant 0 : index
    %c0_7 = arith.constant 0 : index
    %8 = vector.load %arg7[%c0_6, %c0_7] : memref<512x128xf32, #tpu.memory_space<vmem>>, vector<512x128xf32>
    tpu.vector_store %arg7[%c0_6, %c0_7], %7 {strides = array<i32>} : memref<512x128xf32, #tpu.memory_space<vmem>>, vector<512x128xf32>,
    %c0_i32_8 = arith.constant 0 : i32
    %9 = arith.cmpi eq, %arg2, %c0_i32_8 : i32
    %10 = arith.extui %9 : i1 to i32
    %c0_i32_9 = arith.constant 0 : i32
    %11 = arith.cmpi ne, %10, %c0_i32_9 : i32
    scf.if %11 {
      %c0_10 = arith.constant 0 : index
      %c0_11 = arith.constant 0 : index
      %12 = vector.load %arg7[%c0_10, %c0_11] : memref<512x128xf32, #tpu.memory_space<vmem>>, vector<512x128xf32>
      %c0_12 = arith.constant 0 : index
      %c0_13 = arith.constant 0 : index
      %13 = vector.load %arg5[%c0_12, %c0_13] : memref<1x128xf32, #tpu.memory_space<vmem>>, vector<1x128xf32>
      %14 = vector.broadcast %13 : vector<1x128xf32> to vector<512x128xf32>
      %15 = arith.addf %12, %14 : vector<512x128xf32>
      %cst_14 = arith.constant 0.000000e+00 : f32
      %16 = vector.broadcast %cst_14 : f32 to vector<512x128xf32>
      %17 = arith.maximumf %15, %16 : vector<512x128xf32>
      %18 = arith.truncf %17 : vector<512x128xf32> to vector<512x128xbf16>
      %c0_15 = arith.constant 0 : index
      %c0_16 = arith.constant 0 : index
      %19 = vector.load %arg6[%c0_15, %c0_16] : memref<512x128xbf16, #tpu.memory_space<vmem>>, vector<512x128xbf16>
      tpu.vector_store %arg6[%c0_15, %c0_16], %18 {strides = array<i32>} : memref<512x128xbf16, #tpu.memory_space<vmem>>, vector<512x128xbf16>,
    } else {
    }
    return
  }
  func.func @transform_0(%arg0: i32, %arg1: i32, %arg2: i32) -> (i32, i32) {
    %c0_i32 = arith.constant 0 : i32
    return %arg0, %arg2 : i32, i32
  }
  func.func @transform_1(%arg0: i32, %arg1: i32, %arg2: i32) -> (i32, i32) {
    %c0_i32 = arith.constant 0 : i32
    return %arg2, %arg1 : i32, i32
  }
  func.func @transform_2(%arg0: i32, %arg1: i32, %arg2: i32) -> (i32, i32) {
    %c0_i32 = arith.constant 0 : i32
    %c0_i32_0 = arith.constant 0 : i32
    return %c0_i32, %arg1 : i32, i32
  }
  func.func @transform_3(%arg0: i32, %arg1: i32, %arg2: i32) -> (i32, i32) {
    %c0_i32 = arith.constant 0 : i32
    return %arg0, %arg1 : i32, i32
  }
}

module attributes {stable_mosaic.version = 11 : i64} {
  func.func @kernel(%arg0: i32, %arg1: i32, %arg2: memref<1x360x128xbf16, #tpu.memory_space<vmem>>, %arg3: memref<9x128x128xbf16, #tpu.memory_space<vmem>>, %arg4: memref<1x128xf32, #tpu.memory_space<vmem>>, %arg5: memref<1x72x128xbf16, #tpu.memory_space<vmem>>) attributes {dimension_semantics = [#tpu.dimension_semantics<parallel>, #tpu.dimension_semantics<parallel>], iteration_bounds = array<i64: 2, 1>, scalar_prefetch = 0 : i64, scratch_operands = 0 : i64, tpu.core_type = #tpu.core_type<tc>, window_params = [{transform_indices = @transform_0, window_bounds = array<i64: 1, 360, 128>}, {transform_indices = @transform_1, window_bounds = array<i64: 9, 128, 128>}, {transform_indices = @transform_2, window_bounds = array<i64: 1, 128>}, {transform_indices = @transform_3, window_bounds = array<i64: 1, 72, 128>}]} {
    %cst = arith.constant 0.000000e+00 : f32
    %0 = vector.broadcast %cst : f32 to vector<72x128xf32>
    %c0 = arith.constant 0 : index
    %c0_0 = arith.constant 0 : index
    %c0_1 = arith.constant 0 : index
    %1 = vector.load %arg2[%c0, %c0_0, %c0_1] : memref<1x360x128xbf16, #tpu.memory_space<vmem>>, vector<1x72x128xbf16>
    %2 = vector.shape_cast %1 : vector<1x72x128xbf16> to vector<72x128xbf16>
    %c0_2 = arith.constant 0 : index
    %c0_3 = arith.constant 0 : index
    %c0_4 = arith.constant 0 : index
    %3 = vector.load %arg3[%c0_2, %c0_3, %c0_4] : memref<9x128x128xbf16, #tpu.memory_space<vmem>>, vector<1x128x128xbf16>
    %4 = vector.shape_cast %3 : vector<1x128x128xbf16> to vector<128x128xbf16>
    %cst_5 = arith.constant dense<0.000000e+00> : vector<72x128xf32>
    %5 = tpu.matmul %2, %4, %cst_5 {dimension_numbers = #tpu.dot_dimension_numbers<[1], [0], [0], [1], [0, 0, 1, 1], [], []>} : vector<72x128xbf16>, vector<128x128xbf16>, vector<72x128xf32> -> vector<72x128xf32>
    %6 = arith.addf %0, %5 : vector<72x128xf32>
    %c0_6 = arith.constant 0 : index
    %c90 = arith.constant 90 : index
    %c0_7 = arith.constant 0 : index
    %7 = vector.load %arg2[%c0_6, %c90, %c0_7] : memref<1x360x128xbf16, #tpu.memory_space<vmem>>, vector<1x72x128xbf16>
    %8 = vector.shape_cast %7 : vector<1x72x128xbf16> to vector<72x128xbf16>
    %c1 = arith.constant 1 : index
    %c0_8 = arith.constant 0 : index
    %c0_9 = arith.constant 0 : index
    %9 = vector.load %arg3[%c1, %c0_8, %c0_9] : memref<9x128x128xbf16, #tpu.memory_space<vmem>>, vector<1x128x128xbf16>
    %10 = vector.shape_cast %9 : vector<1x128x128xbf16> to vector<128x128xbf16>
    %cst_10 = arith.constant dense<0.000000e+00> : vector<72x128xf32>
    %11 = tpu.matmul %8, %10, %cst_10 {dimension_numbers = #tpu.dot_dimension_numbers<[1], [0], [0], [1], [0, 0, 1, 1], [], []>} : vector<72x128xbf16>, vector<128x128xbf16>, vector<72x128xf32> -> vector<72x128xf32>
    %12 = arith.addf %6, %11 : vector<72x128xf32>
    %c0_11 = arith.constant 0 : index
    %c1_12 = arith.constant 1 : index
    %c0_13 = arith.constant 0 : index
    %13 = vector.load %arg2[%c0_11, %c1_12, %c0_13] : memref<1x360x128xbf16, #tpu.memory_space<vmem>>, vector<1x72x128xbf16>
    %14 = vector.shape_cast %13 : vector<1x72x128xbf16> to vector<72x128xbf16>
    %c2 = arith.constant 2 : index
    %c0_14 = arith.constant 0 : index
    %c0_15 = arith.constant 0 : index
    %15 = vector.load %arg3[%c2, %c0_14, %c0_15] : memref<9x128x128xbf16, #tpu.memory_space<vmem>>, vector<1x128x128xbf16>
    %16 = vector.shape_cast %15 : vector<1x128x128xbf16> to vector<128x128xbf16>
    %cst_16 = arith.constant dense<0.000000e+00> : vector<72x128xf32>
    %17 = tpu.matmul %14, %16, %cst_16 {dimension_numbers = #tpu.dot_dimension_numbers<[1], [0], [0], [1], [0, 0, 1, 1], [], []>} : vector<72x128xbf16>, vector<128x128xbf16>, vector<72x128xf32> -> vector<72x128xf32>
    %18 = arith.addf %12, %17 : vector<72x128xf32>
    %c0_17 = arith.constant 0 : index
    %c180 = arith.constant 180 : index
    %c0_18 = arith.constant 0 : index
    %19 = vector.load %arg2[%c0_17, %c180, %c0_18] : memref<1x360x128xbf16, #tpu.memory_space<vmem>>, vector<1x72x128xbf16>
    %20 = vector.shape_cast %19 : vector<1x72x128xbf16> to vector<72x128xbf16>
    %c3 = arith.constant 3 : index
    %c0_19 = arith.constant 0 : index
    %c0_20 = arith.constant 0 : index
    %21 = vector.load %arg3[%c3, %c0_19, %c0_20] : memref<9x128x128xbf16, #tpu.memory_space<vmem>>, vector<1x128x128xbf16>
    %22 = vector.shape_cast %21 : vector<1x128x128xbf16> to vector<128x128xbf16>
    %cst_21 = arith.constant dense<0.000000e+00> : vector<72x128xf32>
    %23 = tpu.matmul %20, %22, %cst_21 {dimension_numbers = #tpu.dot_dimension_numbers<[1], [0], [0], [1], [0, 0, 1, 1], [], []>} : vector<72x128xbf16>, vector<128x128xbf16>, vector<72x128xf32> -> vector<72x128xf32>
    %24 = arith.addf %18, %23 : vector<72x128xf32>
    %c0_22 = arith.constant 0 : index
    %c270 = arith.constant 270 : index
    %c0_23 = arith.constant 0 : index
    %25 = vector.load %arg2[%c0_22, %c270, %c0_23] : memref<1x360x128xbf16, #tpu.memory_space<vmem>>, vector<1x72x128xbf16>
    %26 = vector.shape_cast %25 : vector<1x72x128xbf16> to vector<72x128xbf16>
    %c4 = arith.constant 4 : index
    %c0_24 = arith.constant 0 : index
    %c0_25 = arith.constant 0 : index
    %27 = vector.load %arg3[%c4, %c0_24, %c0_25] : memref<9x128x128xbf16, #tpu.memory_space<vmem>>, vector<1x128x128xbf16>
    %28 = vector.shape_cast %27 : vector<1x128x128xbf16> to vector<128x128xbf16>
    %cst_26 = arith.constant dense<0.000000e+00> : vector<72x128xf32>
    %29 = tpu.matmul %26, %28, %cst_26 {dimension_numbers = #tpu.dot_dimension_numbers<[1], [0], [0], [1], [0, 0, 1, 1], [], []>} : vector<72x128xbf16>, vector<128x128xbf16>, vector<72x128xf32> -> vector<72x128xf32>
    %30 = arith.addf %24, %29 : vector<72x128xf32>
    %c0_27 = arith.constant 0 : index
    %c181 = arith.constant 181 : index
    %c0_28 = arith.constant 0 : index
    %31 = vector.load %arg2[%c0_27, %c181, %c0_28] : memref<1x360x128xbf16, #tpu.memory_space<vmem>>, vector<1x72x128xbf16>
    %32 = vector.shape_cast %31 : vector<1x72x128xbf16> to vector<72x128xbf16>
    %c5 = arith.constant 5 : index
    %c0_29 = arith.constant 0 : index
    %c0_30 = arith.constant 0 : index
    %33 = vector.load %arg3[%c5, %c0_29, %c0_30] : memref<9x128x128xbf16, #tpu.memory_space<vmem>>, vector<1x128x128xbf16>
    %34 = vector.shape_cast %33 : vector<1x128x128xbf16> to vector<128x128xbf16>
    %cst_31 = arith.constant dense<0.000000e+00> : vector<72x128xf32>
    %35 = tpu.matmul %32, %34, %cst_31 {dimension_numbers = #tpu.dot_dimension_numbers<[1], [0], [0], [1], [0, 0, 1, 1], [], []>} : vector<72x128xbf16>, vector<128x128xbf16>, vector<72x128xf32> -> vector<72x128xf32>
    %36 = arith.addf %30, %35 : vector<72x128xf32>
    %c0_32 = arith.constant 0 : index
    %c9 = arith.constant 9 : index
    %c0_33 = arith.constant 0 : index
    %37 = vector.load %arg2[%c0_32, %c9, %c0_33] : memref<1x360x128xbf16, #tpu.memory_space<vmem>>, vector<1x72x128xbf16>
    %38 = vector.shape_cast %37 : vector<1x72x128xbf16> to vector<72x128xbf16>
    %c6 = arith.constant 6 : index
    %c0_34 = arith.constant 0 : index
    %c0_35 = arith.constant 0 : index
    %39 = vector.load %arg3[%c6, %c0_34, %c0_35] : memref<9x128x128xbf16, #tpu.memory_space<vmem>>, vector<1x128x128xbf16>
    %40 = vector.shape_cast %39 : vector<1x128x128xbf16> to vector<128x128xbf16>
    %cst_36 = arith.constant dense<0.000000e+00> : vector<72x128xf32>
    %41 = tpu.matmul %38, %40, %cst_36 {dimension_numbers = #tpu.dot_dimension_numbers<[1], [0], [0], [1], [0, 0, 1, 1], [], []>} : vector<72x128xbf16>, vector<128x128xbf16>, vector<72x128xf32> -> vector<72x128xf32>
    %42 = arith.addf %36, %41 : vector<72x128xf32>
    %c0_37 = arith.constant 0 : index
    %c99 = arith.constant 99 : index
    %c0_38 = arith.constant 0 : index
    %43 = vector.load %arg2[%c0_37, %c99, %c0_38] : memref<1x360x128xbf16, #tpu.memory_space<vmem>>, vector<1x72x128xbf16>
    %44 = vector.shape_cast %43 : vector<1x72x128xbf16> to vector<72x128xbf16>
    %c7 = arith.constant 7 : index
    %c0_39 = arith.constant 0 : index
    %c0_40 = arith.constant 0 : index
    %45 = vector.load %arg3[%c7, %c0_39, %c0_40] : memref<9x128x128xbf16, #tpu.memory_space<vmem>>, vector<1x128x128xbf16>
    %46 = vector.shape_cast %45 : vector<1x128x128xbf16> to vector<128x128xbf16>
    %cst_41 = arith.constant dense<0.000000e+00> : vector<72x128xf32>
    %47 = tpu.matmul %44, %46, %cst_41 {dimension_numbers = #tpu.dot_dimension_numbers<[1], [0], [0], [1], [0, 0, 1, 1], [], []>} : vector<72x128xbf16>, vector<128x128xbf16>, vector<72x128xf32> -> vector<72x128xf32>
    %48 = arith.addf %42, %47 : vector<72x128xf32>
    %c0_42 = arith.constant 0 : index
    %c10 = arith.constant 10 : index
    %c0_43 = arith.constant 0 : index
    %49 = vector.load %arg2[%c0_42, %c10, %c0_43] : memref<1x360x128xbf16, #tpu.memory_space<vmem>>, vector<1x72x128xbf16>
    %50 = vector.shape_cast %49 : vector<1x72x128xbf16> to vector<72x128xbf16>
    %c8 = arith.constant 8 : index
    %c0_44 = arith.constant 0 : index
    %c0_45 = arith.constant 0 : index
    %51 = vector.load %arg3[%c8, %c0_44, %c0_45] : memref<9x128x128xbf16, #tpu.memory_space<vmem>>, vector<1x128x128xbf16>
    %52 = vector.shape_cast %51 : vector<1x128x128xbf16> to vector<128x128xbf16>
    %cst_46 = arith.constant dense<0.000000e+00> : vector<72x128xf32>
    %53 = tpu.matmul %50, %52, %cst_46 {dimension_numbers = #tpu.dot_dimension_numbers<[1], [0], [0], [1], [0, 0, 1, 1], [], []>} : vector<72x128xbf16>, vector<128x128xbf16>, vector<72x128xf32> -> vector<72x128xf32>
    %54 = arith.addf %48, %53 : vector<72x128xf32>
    %c0_47 = arith.constant 0 : index
    %c0_48 = arith.constant 0 : index
    %55 = vector.load %arg4[%c0_47, %c0_48] : memref<1x128xf32, #tpu.memory_space<vmem>>, vector<1x128xf32>
    %56 = vector.broadcast %55 : vector<1x128xf32> to vector<72x128xf32>
    %57 = arith.addf %54, %56 : vector<72x128xf32>
    %cst_49 = arith.constant 0.000000e+00 : f32
    %58 = vector.broadcast %cst_49 : f32 to vector<72x128xf32>
    %59 = arith.maximumf %57, %58 : vector<72x128xf32>
    %60 = arith.truncf %59 : vector<72x128xf32> to vector<72x128xbf16>
    %c0_50 = arith.constant 0 : index
    %c0_51 = arith.constant 0 : index
    %c0_52 = arith.constant 0 : index
    %61 = vector.load %arg5[%c0_50, %c0_51, %c0_52] : memref<1x72x128xbf16, #tpu.memory_space<vmem>>, vector<1x72x128xbf16>
    %62 = vector.shape_cast %61 : vector<1x72x128xbf16> to vector<72x128xbf16>
    %63 = vector.shape_cast %60 : vector<72x128xbf16> to vector<1x72x128xbf16>
    tpu.vector_store %arg5[%c0_50, %c0_51, %c0_52], %63 {strides = array<i32>} : memref<1x72x128xbf16, #tpu.memory_space<vmem>>, vector<1x72x128xbf16>,
    return
  }
  func.func @transform_0(%arg0: i32, %arg1: i32) -> (i32, i32, i32) {
    %c0_i32 = arith.constant 0 : i32
    %c0_i32_0 = arith.constant 0 : i32
    %c0_i32_1 = arith.constant 0 : i32
    return %arg0, %c0_i32, %c0_i32_0 : i32, i32, i32
  }
  func.func @transform_1(%arg0: i32, %arg1: i32) -> (i32, i32, i32) {
    %c0_i32 = arith.constant 0 : i32
    %c0_i32_0 = arith.constant 0 : i32
    %c0_i32_1 = arith.constant 0 : i32
    return %c0_i32, %c0_i32_0, %arg1 : i32, i32, i32
  }
  func.func @transform_2(%arg0: i32, %arg1: i32) -> (i32, i32) {
    %c0_i32 = arith.constant 0 : i32
    %c0_i32_0 = arith.constant 0 : i32
    return %c0_i32, %arg1 : i32, i32
  }
  func.func @transform_3(%arg0: i32, %arg1: i32) -> (i32, i32, i32) {
    %c0_i32 = arith.constant 0 : i32
    %c0_i32_0 = arith.constant 0 : i32
    return %arg0, %c0_i32, %arg1 : i32, i32, i32
  }
}

module attributes {stable_mosaic.version = 11 : i64} {
  func.func @kernel(%arg0: i32, %arg1: i32, %arg2: i32, %arg3: memref<128x128xbf16, #tpu.memory_space<vmem>>, %arg4: memref<128x128xbf16, #tpu.memory_space<vmem>>, %arg5: memref<1x128xf32, #tpu.memory_space<vmem>>, %arg6: memref<128x128xbf16, #tpu.memory_space<vmem>>, %arg7: memref<128x128xf32, #tpu.memory_space<vmem>>) attributes {dimension_semantics = [#tpu.dimension_semantics<parallel>, #tpu.dimension_semantics<parallel>, #tpu.dimension_semantics<arbitrary>], iteration_bounds = array<i64: 1, 1, 1>, scalar_prefetch = 0 : i64, scratch_operands = 1 : i64, tpu.core_type = #tpu.core_type<tc>, window_params = [{transform_indices = @transform_0, window_bounds = array<i64: 128, 128>}, {transform_indices = @transform_1, window_bounds = array<i64: 128, 128>}, {transform_indices = @transform_2, window_bounds = array<i64: 1, 128>}, {transform_indices = @transform_3, window_bounds = array<i64: 128, 128>}]} {
    %c0_i32 = arith.constant 0 : i32
    %0 = arith.cmpi eq, %arg2, %c0_i32 : i32
    %1 = arith.extui %0 : i1 to i32
    %c0_i32_0 = arith.constant 0 : i32
    %2 = arith.cmpi ne, %1, %c0_i32_0 : i32
    scf.if %2 {
      %cst_10 = arith.constant 0.000000e+00 : f32
      %12 = vector.broadcast %cst_10 : f32 to vector<128x128xf32>
      %c0_11 = arith.constant 0 : index
      %c0_12 = arith.constant 0 : index
      %13 = vector.load %arg7[%c0_11, %c0_12] : memref<128x128xf32, #tpu.memory_space<vmem>>, vector<128x128xf32>
      tpu.vector_store %arg7[%c0_11, %c0_12], %12 {strides = array<i32>} : memref<128x128xf32, #tpu.memory_space<vmem>>, vector<128x128xf32>,
    } else {
    }
    %c0 = arith.constant 0 : index
    %c0_1 = arith.constant 0 : index
    %3 = vector.load %arg7[%c0, %c0_1] : memref<128x128xf32, #tpu.memory_space<vmem>>, vector<128x128xf32>
    %c0_2 = arith.constant 0 : index
    %c0_3 = arith.constant 0 : index
    %4 = vector.load %arg3[%c0_2, %c0_3] : memref<128x128xbf16, #tpu.memory_space<vmem>>, vector<128x128xbf16>
    %c0_4 = arith.constant 0 : index
    %c0_5 = arith.constant 0 : index
    %5 = vector.load %arg4[%c0_4, %c0_5] : memref<128x128xbf16, #tpu.memory_space<vmem>>, vector<128x128xbf16>
    %cst = arith.constant dense<0.000000e+00> : vector<128x128xf32>
    %6 = tpu.matmul %4, %5, %cst {dimension_numbers = #tpu.dot_dimension_numbers<[1], [0], [0], [1], [0, 0, 1, 1], [], []>} : vector<128x128xbf16>, vector<128x128xbf16>, vector<128x128xf32> -> vector<128x128xf32>
    %7 = arith.addf %3, %6 : vector<128x128xf32>
    %c0_6 = arith.constant 0 : index
    %c0_7 = arith.constant 0 : index
    %8 = vector.load %arg7[%c0_6, %c0_7] : memref<128x128xf32, #tpu.memory_space<vmem>>, vector<128x128xf32>
    tpu.vector_store %arg7[%c0_6, %c0_7], %7 {strides = array<i32>} : memref<128x128xf32, #tpu.memory_space<vmem>>, vector<128x128xf32>,
    %c0_i32_8 = arith.constant 0 : i32
    %9 = arith.cmpi eq, %arg2, %c0_i32_8 : i32
    %10 = arith.extui %9 : i1 to i32
    %c0_i32_9 = arith.constant 0 : i32
    %11 = arith.cmpi ne, %10, %c0_i32_9 : i32
    scf.if %11 {
      %c0_10 = arith.constant 0 : index
      %c0_11 = arith.constant 0 : index
      %12 = vector.load %arg7[%c0_10, %c0_11] : memref<128x128xf32, #tpu.memory_space<vmem>>, vector<128x128xf32>
      %c0_12 = arith.constant 0 : index
      %c0_13 = arith.constant 0 : index
      %13 = vector.load %arg5[%c0_12, %c0_13] : memref<1x128xf32, #tpu.memory_space<vmem>>, vector<1x128xf32>
      %14 = vector.broadcast %13 : vector<1x128xf32> to vector<128x128xf32>
      %15 = arith.addf %12, %14 : vector<128x128xf32>
      %16 = arith.truncf %15 : vector<128x128xf32> to vector<128x128xbf16>
      %c0_14 = arith.constant 0 : index
      %c0_15 = arith.constant 0 : index
      %17 = vector.load %arg6[%c0_14, %c0_15] : memref<128x128xbf16, #tpu.memory_space<vmem>>, vector<128x128xbf16>
      tpu.vector_store %arg6[%c0_14, %c0_15], %16 {strides = array<i32>} : memref<128x128xbf16, #tpu.memory_space<vmem>>, vector<128x128xbf16>,
    } else {
    }
    return
  }
  func.func @transform_0(%arg0: i32, %arg1: i32, %arg2: i32) -> (i32, i32) {
    %c0_i32 = arith.constant 0 : i32
    return %arg0, %arg2 : i32, i32
  }
  func.func @transform_1(%arg0: i32, %arg1: i32, %arg2: i32) -> (i32, i32) {
    %c0_i32 = arith.constant 0 : i32
    return %arg2, %arg1 : i32, i32
  }
  func.func @transform_2(%arg0: i32, %arg1: i32, %arg2: i32) -> (i32, i32) {
    %c0_i32 = arith.constant 0 : i32
    %c0_i32_0 = arith.constant 0 : i32
    return %c0_i32, %arg1 : i32, i32
  }
  func.func @transform_3(%arg0: i32, %arg1: i32, %arg2: i32) -> (i32, i32) {
    %c0_i32 = arith.constant 0 : i32
    return %arg0, %arg1 : i32, i32
  }
}

module attributes {stable_mosaic.version = 11 : i64} {
  func.func @kernel(%arg0: i32, %arg1: i32, %arg2: i32, %arg3: memref<128x128xbf16, #tpu.memory_space<vmem>>, %arg4: memref<128x128xbf16, #tpu.memory_space<vmem>>, %arg5: memref<1x128xf32, #tpu.memory_space<vmem>>, %arg6: memref<128x128xbf16, #tpu.memory_space<vmem>>, %arg7: memref<128x128xf32, #tpu.memory_space<vmem>>, %arg8: memref<128x128xf32, #tpu.memory_space<vmem>>) attributes {dimension_semantics = [#tpu.dimension_semantics<parallel>, #tpu.dimension_semantics<parallel>, #tpu.dimension_semantics<arbitrary>], iteration_bounds = array<i64: 1, 1, 1>, scalar_prefetch = 0 : i64, scratch_operands = 1 : i64, tpu.core_type = #tpu.core_type<tc>, window_params = [{transform_indices = @transform_0, window_bounds = array<i64: 128, 128>}, {transform_indices = @transform_1, window_bounds = array<i64: 128, 128>}, {transform_indices = @transform_2, window_bounds = array<i64: 1, 128>}, {transform_indices = @transform_3, window_bounds = array<i64: 128, 128>}, {transform_indices = @transform_4, window_bounds = array<i64: 128, 128>}]} {
    %c0_i32 = arith.constant 0 : i32
    %0 = arith.cmpi eq, %arg2, %c0_i32 : i32
    %1 = arith.extui %0 : i1 to i32
    %c0_i32_0 = arith.constant 0 : i32
    %2 = arith.cmpi ne, %1, %c0_i32_0 : i32
    scf.if %2 {
      %cst_10 = arith.constant 0.000000e+00 : f32
      %12 = vector.broadcast %cst_10 : f32 to vector<128x128xf32>
      %c0_11 = arith.constant 0 : index
      %c0_12 = arith.constant 0 : index
      %13 = vector.load %arg8[%c0_11, %c0_12] : memref<128x128xf32, #tpu.memory_space<vmem>>, vector<128x128xf32>
      tpu.vector_store %arg8[%c0_11, %c0_12], %12 {strides = array<i32>} : memref<128x128xf32, #tpu.memory_space<vmem>>, vector<128x128xf32>,
    } else {
    }
    %c0 = arith.constant 0 : index
    %c0_1 = arith.constant 0 : index
    %3 = vector.load %arg8[%c0, %c0_1] : memref<128x128xf32, #tpu.memory_space<vmem>>, vector<128x128xf32>
    %c0_2 = arith.constant 0 : index
    %c0_3 = arith.constant 0 : index
    %4 = vector.load %arg3[%c0_2, %c0_3] : memref<128x128xbf16, #tpu.memory_space<vmem>>, vector<128x128xbf16>
    %c0_4 = arith.constant 0 : index
    %c0_5 = arith.constant 0 : index
    %5 = vector.load %arg4[%c0_4, %c0_5] : memref<128x128xbf16, #tpu.memory_space<vmem>>, vector<128x128xbf16>
    %cst = arith.constant dense<0.000000e+00> : vector<128x128xf32>
    %6 = tpu.matmul %4, %5, %cst {dimension_numbers = #tpu.dot_dimension_numbers<[1], [0], [0], [1], [0, 0, 1, 1], [], []>} : vector<128x128xbf16>, vector<128x128xbf16>, vector<128x128xf32> -> vector<128x128xf32>
    %7 = arith.addf %3, %6 : vector<128x128xf32>
    %c0_6 = arith.constant 0 : index
    %c0_7 = arith.constant 0 : index
    %8 = vector.load %arg8[%c0_6, %c0_7] : memref<128x128xf32, #tpu.memory_space<vmem>>, vector<128x128xf32>
    tpu.vector_store %arg8[%c0_6, %c0_7], %7 {strides = array<i32>} : memref<128x128xf32, #tpu.memory_space<vmem>>, vector<128x128xf32>,
    %c0_i32_8 = arith.constant 0 : i32
    %9 = arith.cmpi eq, %arg2, %c0_i32_8 : i32
    %10 = arith.extui %9 : i1 to i32
    %c0_i32_9 = arith.constant 0 : i32
    %11 = arith.cmpi ne, %10, %c0_i32_9 : i32
    scf.if %11 {
      %c0_10 = arith.constant 0 : index
      %c0_11 = arith.constant 0 : index
      %12 = vector.load %arg8[%c0_10, %c0_11] : memref<128x128xf32, #tpu.memory_space<vmem>>, vector<128x128xf32>
      %c0_12 = arith.constant 0 : index
      %c0_13 = arith.constant 0 : index
      %13 = vector.load %arg5[%c0_12, %c0_13] : memref<1x128xf32, #tpu.memory_space<vmem>>, vector<1x128xf32>
      %14 = vector.broadcast %13 : vector<1x128xf32> to vector<128x128xf32>
      %15 = arith.addf %12, %14 : vector<128x128xf32>
      %c0_14 = arith.constant 0 : index
      %c0_15 = arith.constant 0 : index
      %16 = vector.load %arg6[%c0_14, %c0_15] : memref<128x128xbf16, #tpu.memory_space<vmem>>, vector<128x128xbf16>
      %17 = arith.extf %16 : vector<128x128xbf16> to vector<128x128xf32>
      %18 = arith.addf %15, %17 : vector<128x128xf32>
      %cst_16 = arith.constant 0.000000e+00 : f32
      %19 = vector.broadcast %cst_16 : f32 to vector<128x128xf32>
      %20 = arith.maximumf %18, %19 : vector<128x128xf32>
      %c0_17 = arith.constant 0 : index
      %c0_18 = arith.constant 0 : index
      %21 = vector.load %arg7[%c0_17, %c0_18] : memref<128x128xf32, #tpu.memory_space<vmem>>, vector<128x128xf32>
      tpu.vector_store %arg7[%c0_17, %c0_18], %20 {strides = array<i32>} : memref<128x128xf32, #tpu.memory_space<vmem>>, vector<128x128xf32>,
    } else {
    }
    return
  }
  func.func @transform_0(%arg0: i32, %arg1: i32, %arg2: i32) -> (i32, i32) {
    %c0_i32 = arith.constant 0 : i32
    return %arg0, %arg2 : i32, i32
  }
  func.func @transform_1(%arg0: i32, %arg1: i32, %arg2: i32) -> (i32, i32) {
    %c0_i32 = arith.constant 0 : i32
    return %arg2, %arg1 : i32, i32
  }
  func.func @transform_2(%arg0: i32, %arg1: i32, %arg2: i32) -> (i32, i32) {
    %c0_i32 = arith.constant 0 : i32
    %c0_i32_0 = arith.constant 0 : i32
    return %c0_i32, %arg1 : i32, i32
  }
  func.func @transform_3(%arg0: i32, %arg1: i32, %arg2: i32) -> (i32, i32) {
    %c0_i32 = arith.constant 0 : i32
    return %arg0, %arg1 : i32, i32
  }
  func.func @transform_4(%arg0: i32, %arg1: i32, %arg2: i32) -> (i32, i32) {
    %c0_i32 = arith.constant 0 : i32
    return %arg0, %arg1 : i32, i32
  }
}

</mosaic_0001>

<bundles_post_ra>
// kernel: resnet_bottleneck_forward.4
= control target key start
LH: loop header
LB: loop body
LE: loop exit
PB: predicated region body
PF: predicated region fallthrough
CT: control target
= control target key end

     0   :  { %s2251_s1 = inlined_call_operand.vmem [shape: bf16[128,128], index: 1, kind: input, shape index: {}]   ;;  %s2252_s0 = inlined_call_operand.vmem [shape: bf16[512,128], index: 0, kind: input, shape index: {}]   ;;  %s2253_s2 = inlined_call_operand.vmem [shape: f32[1,128], index: 2, kind: input, shape index: {}]   ;;  %s2254_s3 = inlined_call_operand.vmem [shape: bf16[512,128], index: 3, kind: output, shape index: {}]  }
   0x1   :  { %v1906_v0 = vld [vmem:[%s2251_s1 + $0x38] sm:$0xff]   ;;  %v1907_v1 = vld [vmem:[%s2251_s1 + $0x30] sm:$0xff]   ;;  %v1908_v2 = vld [vmem:[%s2251_s1 + $0x28] sm:$0xff]  }
   0x2   :  { %1810 = vmatprep.subr.bf16.mxu0 %v1906_v0  ;;  %1890 = vmatprep.subr.bf16.mxu1 %v1906_v0  ;;  %v1909_v3 = vld [vmem:[%s2251_s1 + $0x20] sm:$0xff]   ;;  %v1910_v6 = vld [vmem:[%s2251_s1 + $0x18] sm:$0xff]   ;;  %v1911_v7 = vld [vmem:[%s2251_s1 + $0x10] sm:$0xff]  }
   0x3   :  { %1811 = vmatpush3.bf16.msra.mxu0 %v1906_v0  ;;  %1898 = vmatpush3.bf16.msra.mxu1 %v1906_v0  ;;  %v1914_v4 = vld [vmem:[%s2252_s0] sm:$0xff]   ;;  %v1912_v8 = vld [vmem:[%s2251_s1 + $0x8] sm:$0xff]   ;;  %v1918_v12 = vld [vmem:[%s2252_s0 + $0x10] sm:$0xff]  }
   0x4   :  { %1812 = vmatprep.subr.bf16.mxu0 %v1907_v1  ;;  %1891 = vmatprep.subr.bf16.mxu1 %v1907_v1  ;;  %v1915_v5 = vld [vmem:[%s2252_s0 + $0x80] sm:$0xff]   ;;  %v1916_v10 = vld [vmem:[%s2252_s0 + $0x8] sm:$0xff]   ;;  %v1919_v13 = vld [vmem:[%s2252_s0 + $0x90] sm:$0xff]  }
   0x5   :  { %1826 = vmatprep.mubr.bf16.mxu0 %v1914_v4  ;;  %1858 = vmatprep.mubr.bf16.mxu1 %v1915_v5  ;;  %v1913_v9 = vld [vmem:[%s2251_s1] sm:$0xff]   ;;  %v1917_v11 = vld [vmem:[%s2252_s0 + $0x88] sm:$0xff]   ;;  %v1920_v14 = vld [vmem:[%s2252_s0 + $0x18] sm:$0xff]  }
   0x6   :  { %v1921_v15 = vld [vmem:[%s2252_s0 + $0x98] sm:$0xff]   ;;  %v1922_v16 = vld [vmem:[%s2252_s0 + $0x20] sm:$0xff]   ;;  %v1924_v18 = vld [vmem:[%s2252_s0 + $0x28] sm:$0xff]  }
   0x7   :  { %1813 = vmatpush3.bf16.msra.mxu0 %v1907_v1  ;;  %1899 = vmatpush3.bf16.msra.mxu1 %v1907_v1  ;;  %v1923_v17 = vld [vmem:[%s2252_s0 + $0xa0] sm:$0xff]   ;;  %v1925_v19 = vld [vmem:[%s2252_s0 + $0xa8] sm:$0xff]   ;;  %v1926_v20 = vld [vmem:[%s2252_s0 + $0x30] sm:$0xff]  }
   0x8   :  { %1814 = vmatprep.subr.bf16.mxu0 %v1908_v2  ;;  %1892 = vmatprep.subr.bf16.mxu1 %v1908_v2  ;;  %v1927_v21 = vld [vmem:[%s2252_s0 + $0xb0] sm:$0xff]   ;;  %v1928_v22 = vld [vmem:[%s2252_s0 + $0x38] sm:$0xff]   ;;  %v1930_v24 = vld [vmem:[%s2252_s0 + $0x40] sm:$0xff]  }
   0x9   :  { %v1929_v23 = vld [vmem:[%s2252_s0 + $0xb8] sm:$0xff]   ;;  %v1931_v25 = vld [vmem:[%s2252_s0 + $0xc0] sm:$0xff]   ;;  %v1932_v26 = vld [vmem:[%s2252_s0 + $0x48] sm:$0xff]  }
   0xa   :  { %v1933_v27 = vld [vmem:[%s2252_s0 + $0xc8] sm:$0xff]   ;;  %v1934_v28 = vld [vmem:[%s2252_s0 + $0x50] sm:$0xff]   ;;  %v1936_v30 = vld [vmem:[%s2252_s0 + $0x58] sm:$0xff]  }
   0xb   :  { %1815 = vmatpush3.bf16.msra.mxu0 %v1908_v2  ;;  %1900 = vmatpush3.bf16.msra.mxu1 %v1908_v2  ;;  %v1935_v29 = vld [vmem:[%s2252_s0 + $0xd0] sm:$0xff]   ;;  %v1937_v31 = vld [vmem:[%s2252_s0 + $0xd8] sm:$0xff]   ;;  %v1938_v32 = vld [vmem:[%s2252_s0 + $0x60] sm:$0xff]  }
   0xc   :  { %1816 = vmatprep.subr.bf16.mxu0 %v1909_v3  ;;  %1893 = vmatprep.subr.bf16.mxu1 %v1909_v3  ;;  %v1939_v33 = vld [vmem:[%s2252_s0 + $0xe0] sm:$0xff]   ;;  %v1940_v34 = vld [vmem:[%s2252_s0 + $0x68] sm:$0xff]   ;;  %v1942_v36 = vld [vmem:[%s2252_s0 + $0x70] sm:$0xff]  }
   0xd   :  { %v1941_v35 = vld [vmem:[%s2252_s0 + $0xe8] sm:$0xff]   ;;  %v1943_v37 = vld [vmem:[%s2252_s0 + $0xf0] sm:$0xff]   ;;  %v1944_v38 = vld [vmem:[%s2252_s0 + $0x78] sm:$0xff]  }
   0xe   :  { %v1945_v39 = vld [vmem:[%s2252_s0 + $0xf8] sm:$0xff]   ;;  %v2089_v40 = vld [vmem:[%s2253_s2] ss:$0 sm:$0xff] }
   0xf   :  { %1817 = vmatpush3.bf16.msra.mxu0 %v1909_v3  ;;  %1901 = vmatpush3.bf16.msra.mxu1 %v1909_v3 }
  0x10   :  { %1818 = vmatprep.subr.bf16.mxu0 %v1910_v6  ;;  %1894 = vmatprep.subr.bf16.mxu1 %v1910_v6 }
  0x13   :  { %1819 = vmatpush3.bf16.msra.mxu0 %v1910_v6  ;;  %1902 = vmatpush3.bf16.msra.mxu1 %v1910_v6 }
  0x14   :  { %1820 = vmatprep.subr.bf16.mxu0 %v1911_v7  ;;  %1895 = vmatprep.subr.bf16.mxu1 %v1911_v7 }
  0x17   :  { %1821 = vmatpush3.bf16.msra.mxu0 %v1911_v7  ;;  %1903 = vmatpush3.bf16.msra.mxu1 %v1911_v7 }
  0x18   :  { %1822 = vmatprep.subr.bf16.mxu0 %v1912_v8  ;;  %1896 = vmatprep.subr.bf16.mxu1 %v1912_v8 }
  0x1b   :  { %1823 = vmatpush3.bf16.msra.mxu0 %v1912_v8  ;;  %1904 = vmatpush3.bf16.msra.mxu1 %v1912_v8 }
  0x1c   :  { %1824 = vmatprep.subr.bf16.mxu0 %v1913_v9  ;;  %1897 = vmatprep.subr.bf16.mxu1 %v1913_v9 }
  0x1f   :  { %1825 = vmatpush3.bf16.msra.mxu0 %v1913_v9  ;;  %1905 = vmatpush3.bf16.msra.mxu1 %v1913_v9 }
  0x22   :  { %1827 = vmatmul.mubr.bf16.vlgmr.msra.gmra.mxu0 %v1916_v10  ;;  %1859 = vmatmul.mubr.bf16.vlgmr.msra.gmra.mxu1 %v1917_v11 }
  0x23   :  { %1830 = vmatprep.mubr.bf16.mxu0 %v1918_v12  ;;  %1862 = vmatprep.mubr.bf16.mxu1 %v1919_v13 }
  0x2a   :  { %1831 = vmatmul.mubr.bf16.gmra.mxu0 %v1920_v14  ;;  %1863 = vmatmul.mubr.bf16.gmra.mxu1 %v1921_v15 }
  0x2b   :  { %1834 = vmatprep.mubr.bf16.mxu0 %v1922_v16  ;;  %1866 = vmatprep.mubr.bf16.mxu1 %v1923_v17 }
  0x32   :  { %1835 = vmatmul.mubr.bf16.gmra.mxu0 %v1924_v18  ;;  %1867 = vmatmul.mubr.bf16.gmra.mxu1 %v1925_v19 }
  0x33   :  { %1838 = vmatprep.mubr.bf16.mxu0 %v1926_v20  ;;  %1870 = vmatprep.mubr.bf16.mxu1 %v1927_v21 }
  0x3a   :  { %1839 = vmatmul.mubr.bf16.gmra.mxu0 %v1928_v22  ;;  %1871 = vmatmul.mubr.bf16.gmra.mxu1 %v1929_v23 }
  0x3b   :  { %1842 = vmatprep.mubr.bf16.mxu0 %v1930_v24  ;;  %1874 = vmatprep.mubr.bf16.mxu1 %v1931_v25 }
  0x42   :  { %1843 = vmatmul.mubr.bf16.gmra.mxu0 %v1932_v26  ;;  %1875 = vmatmul.mubr.bf16.gmra.mxu1 %v1933_v27 }
  0x43   :  { %1846 = vmatprep.mubr.bf16.mxu0 %v1934_v28  ;;  %1878 = vmatprep.mubr.bf16.mxu1 %v1935_v29 }
  0x4a   :  { %1847 = vmatmul.mubr.bf16.gmra.mxu0 %v1936_v30  ;;  %1879 = vmatmul.mubr.bf16.gmra.mxu1 %v1937_v31 }
  0x4b   :  { %1850 = vmatprep.mubr.bf16.mxu0 %v1938_v32  ;;  %1882 = vmatprep.mubr.bf16.mxu1 %v1939_v33 }
  0x52   :  { %1851 = vmatmul.mubr.bf16.gmra.mxu0 %v1940_v34  ;;  %1883 = vmatmul.mubr.bf16.gmra.mxu1 %v1941_v35 }
  0x53   :  { %1854 = vmatprep.mubr.bf16.mxu0 %v1942_v36  ;;  %1886 = vmatprep.mubr.bf16.mxu1 %v1943_v37 }
  0x5a   :  { %1855 = vmatmul.mubr.bf16.gmra.mxu0 %v1944_v38  ;;  %1887 = vmatmul.mubr.bf16.gmra.mxu1 %v1945_v39 }
  0xe2   :  { %v1828_v41 = vpop.f32.mrf.mxu0  ;;  %v1860_v42 = vpop.f32.mrf.mxu1 }
  0xe3   :  { %v960_v43 = vadd.f32 %v1828_v41, %v2089_v40  ;;  %v992_v44 = vadd.f32 %v1860_v42, %v2089_v40 }
  0xe4   :  { %v501_v45 = vpop.f32.mrf.mxu0  ;;  %v629_v46 = vpop.f32.mrf.mxu1 }
  0xe5   :  { %v958_v47 = vadd.f32 %v2089_v40, %v501_v45  ;;  %v990_v48 = vadd.f32 %v2089_v40, %v629_v46  ;;  %v1024_v53 = vmax.f32 %v960_v43, 0.0  ;;  %v1056_v54 = vmax.f32 %v992_v44, 0.0 }
  0xe6   :  { %v1829_v49 = vpop.f32.mrf.mxu0  ;;  %v1861_v50 = vpop.f32.mrf.mxu1 }
  0xe7   :  { %v961_v51 = vadd.f32 %v1829_v49, %v2089_v40  ;;  %v993_v52 = vadd.f32 %v1861_v50, %v2089_v40  ;;  %v1022_v61 = vmax.f32 %v958_v47, 0.0  ;;  %v1054_v62 = vmax.f32 %v990_v48, 0.0 }
  0xe8   :  { %v504_v55 = vpop.f32.mrf.mxu0  ;;  %v632_v56 = vpop.f32.mrf.mxu1 }
  0xe9   :  { %v1025_v57 = vmax.f32 %v961_v51, 0.0  ;;  %v1057_v58 = vmax.f32 %v993_v52, 0.0  ;;  %v959_v59 = vadd.f32 %v2089_v40, %v504_v55  ;;  %v991_v60 = vadd.f32 %v2089_v40, %v632_v56 }
  0xea   :  { %v1832_v63 = vpop.f32.mrf.mxu0  ;;  %v1864_v0 = vpop.f32.mrf.mxu1 }
  0xeb   :  { %v1587_v1 = vpack.c.bf16 %v1025_v57, %v1024_v53  ;;  %v1667_v2 = vpack.c.bf16 %v1057_v58, %v1056_v54  ;;  %v1023_v3 = vmax.f32 %v959_v59, 0.0  ;;  %v1055_v4 = vmax.f32 %v991_v60, 0.0 }
  0xec   :  { %v964_v5 = vadd.f32 %v1832_v63, %v2089_v40  ;;  %v996_v6 = vadd.f32 %v1864_v0, %v2089_v40  ;;  %v517_v7 = vpop.f32.mrf.mxu0  ;;  %v645_v8 = vpop.f32.mrf.mxu1 }
  0xed   :  { %1739 = vst [vmem:[%s2254_s3 + $0x8] sm:$0xff] %v1587_v1   ;;  %1755 = vst [vmem:[%s2254_s3 + $0x88] sm:$0xff] %v1667_v2   ;;  %v1582_v9 = vpack.c.bf16 %v1023_v3, %v1022_v61  ;;  %v1662_v10 = vpack.c.bf16 %v1055_v4, %v1054_v62  ;;  %v962_v11 = vadd.f32 %v2089_v40, %v517_v7 }
  0xee   :  { %v994_v12 = vadd.f32 %v2089_v40, %v645_v8  ;;  %v1833_v13 = vpop.f32.mrf.mxu0  ;;  %v1865_v14 = vpop.f32.mrf.mxu1  ;;  %v1028_v17 = vmax.f32 %v964_v5, 0.0  ;;  %v1060_v18 = vmax.f32 %v996_v6, 0.0 }
  0xef   :  { %1583 = vst [vmem:[%s2254_s3] sm:$0xff] %v1582_v9   ;;  %1754 = vst [vmem:[%s2254_s3 + $0x80] sm:$0xff] %v1662_v10   ;;  %v965_v15 = vadd.f32 %v1833_v13, %v2089_v40  ;;  %v997_v16 = vadd.f32 %v1865_v14, %v2089_v40  ;;  %v1026_v25 = vmax.f32 %v962_v11, 0.0 }
  0xf0   :  { %v520_v19 = vpop.f32.mrf.mxu0  ;;  %v648_v20 = vpop.f32.mrf.mxu1  ;;  %v1058_v26 = vmax.f32 %v994_v12, 0.0 }
  0xf1   :  { %v1029_v21 = vmax.f32 %v965_v15, 0.0  ;;  %v1061_v22 = vmax.f32 %v997_v16, 0.0  ;;  %v963_v23 = vadd.f32 %v2089_v40, %v520_v19  ;;  %v995_v24 = vadd.f32 %v2089_v40, %v648_v20 }
  0xf2   :  { %v1836_v27 = vpop.f32.mrf.mxu0  ;;  %v1868_v28 = vpop.f32.mrf.mxu1 }
  0xf3   :  { %v1597_v29 = vpack.c.bf16 %v1029_v21, %v1028_v17  ;;  %v1677_v30 = vpack.c.bf16 %v1061_v22, %v1060_v18  ;;  %v1027_v31 = vmax.f32 %v963_v23, 0.0  ;;  %v1059_v32 = vmax.f32 %v995_v24, 0.0 }
  0xf4   :  { %v968_v33 = vadd.f32 %v1836_v27, %v2089_v40  ;;  %v1000_v34 = vadd.f32 %v1868_v28, %v2089_v40  ;;  %v533_v35 = vpop.f32.mrf.mxu0  ;;  %v661_v36 = vpop.f32.mrf.mxu1 }
  0xf5   :  { %1741 = vst [vmem:[%s2254_s3 + $0x18] sm:$0xff] %v1597_v29   ;;  %1757 = vst [vmem:[%s2254_s3 + $0x98] sm:$0xff] %v1677_v30   ;;  %v1592_v37 = vpack.c.bf16 %v1027_v31, %v1026_v25  ;;  %v1672_v38 = vpack.c.bf16 %v1059_v32, %v1058_v26  ;;  %v966_v39 = vadd.f32 %v2089_v40, %v533_v35 }
  0xf6   :  { %v998_v41 = vadd.f32 %v2089_v40, %v661_v36  ;;  %v1837_v42 = vpop.f32.mrf.mxu0  ;;  %v1869_v43 = vpop.f32.mrf.mxu1  ;;  %v1032_v46 = vmax.f32 %v968_v33, 0.0  ;;  %v1064_v47 = vmax.f32 %v1000_v34, 0.0 }
  0xf7   :  { %1740 = vst [vmem:[%s2254_s3 + $0x10] sm:$0xff] %v1592_v37   ;;  %1756 = vst [vmem:[%s2254_s3 + $0x90] sm:$0xff] %v1672_v38   ;;  %v969_v44 = vadd.f32 %v1837_v42, %v2089_v40  ;;  %v1001_v45 = vadd.f32 %v1869_v43, %v2089_v40  ;;  %v1030_v54 = vmax.f32 %v966_v39, 0.0 }
  0xf8   :  { %v536_v48 = vpop.f32.mrf.mxu0  ;;  %v664_v49 = vpop.f32.mrf.mxu1  ;;  %v1062_v55 = vmax.f32 %v998_v41, 0.0 }
  0xf9   :  { %v1033_v50 = vmax.f32 %v969_v44, 0.0  ;;  %v1065_v51 = vmax.f32 %v1001_v45, 0.0  ;;  %v967_v52 = vadd.f32 %v2089_v40, %v536_v48  ;;  %v999_v53 = vadd.f32 %v2089_v40, %v664_v49 }
  0xfa   :  { %v1840_v56 = vpop.f32.mrf.mxu0  ;;  %v1872_v57 = vpop.f32.mrf.mxu1 }
  0xfb   :  { %v1607_v58 = vpack.c.bf16 %v1033_v50, %v1032_v46  ;;  %v1687_v59 = vpack.c.bf16 %v1065_v51, %v1064_v47  ;;  %v1031_v60 = vmax.f32 %v967_v52, 0.0  ;;  %v1063_v61 = vmax.f32 %v999_v53, 0.0 }
  0xfc   :  { %v972_v62 = vadd.f32 %v1840_v56, %v2089_v40  ;;  %v1004_v63 = vadd.f32 %v1872_v57, %v2089_v40  ;;  %v549_v0 = vpop.f32.mrf.mxu0  ;;  %v677_v1 = vpop.f32.mrf.mxu1 }
  0xfd   :  { %1743 = vst [vmem:[%s2254_s3 + $0x28] sm:$0xff] %v1607_v58   ;;  %1759 = vst [vmem:[%s2254_s3 + $0xa8] sm:$0xff] %v1687_v59   ;;  %v1602_v2 = vpack.c.bf16 %v1031_v60, %v1030_v54  ;;  %v1682_v3 = vpack.c.bf16 %v1063_v61, %v1062_v55  ;;  %v970_v4 = vadd.f32 %v2089_v40, %v549_v0 }
  0xfe   :  { %v1002_v5 = vadd.f32 %v2089_v40, %v677_v1  ;;  %v1841_v6 = vpop.f32.mrf.mxu0  ;;  %v1873_v7 = vpop.f32.mrf.mxu1  ;;  %v1036_v10 = vmax.f32 %v972_v62, 0.0  ;;  %v1068_v11 = vmax.f32 %v1004_v63, 0.0 }
  0xff   :  { %1742 = vst [vmem:[%s2254_s3 + $0x20] sm:$0xff] %v1602_v2   ;;  %1758 = vst [vmem:[%s2254_s3 + $0xa0] sm:$0xff] %v1682_v3   ;;  %v973_v8 = vadd.f32 %v1841_v6, %v2089_v40  ;;  %v1005_v9 = vadd.f32 %v1873_v7, %v2089_v40  ;;  %v1034_v18 = vmax.f32 %v970_v4, 0.0 }
 0x100   :  { %v552_v12 = vpop.f32.mrf.mxu0  ;;  %v680_v13 = vpop.f32.mrf.mxu1  ;;  %v1066_v19 = vmax.f32 %v1002_v5, 0.0 }
 0x101   :  { %v1037_v14 = vmax.f32 %v973_v8, 0.0  ;;  %v1069_v15 = vmax.f32 %v1005_v9, 0.0  ;;  %v971_v16 = vadd.f32 %v2089_v40, %v552_v12  ;;  %v1003_v17 = vadd.f32 %v2089_v40, %v680_v13 }
 0x102   :  { %v1844_v20 = vpop.f32.mrf.mxu0  ;;  %v1876_v21 = vpop.f32.mrf.mxu1 }
 0x103   :  { %v1617_v22 = vpack.c.bf16 %v1037_v14, %v1036_v10  ;;  %v1697_v23 = vpack.c.bf16 %v1069_v15, %v1068_v11  ;;  %v1035_v24 = vmax.f32 %v971_v16, 0.0  ;;  %v1067_v25 = vmax.f32 %v1003_v17, 0.0 }
 0x104   :  { %v976_v26 = vadd.f32 %v1844_v20, %v2089_v40  ;;  %v1008_v27 = vadd.f32 %v1876_v21, %v2089_v40  ;;  %v565_v28 = vpop.f32.mrf.mxu0  ;;  %v693_v29 = vpop.f32.mrf.mxu1 }
 0x105   :  { %1745 = vst [vmem:[%s2254_s3 + $0x38] sm:$0xff] %v1617_v22   ;;  %1761 = vst [vmem:[%s2254_s3 + $0xb8] sm:$0xff] %v1697_v23   ;;  %v1612_v30 = vpack.c.bf16 %v1035_v24, %v1034_v18  ;;  %v1692_v31 = vpack.c.bf16 %v1067_v25, %v1066_v19  ;;  %v974_v32 = vadd.f32 %v2089_v40, %v565_v28 }
 0x106   :  { %v1006_v33 = vadd.f32 %v2089_v40, %v693_v29  ;;  %v1845_v34 = vpop.f32.mrf.mxu0  ;;  %v1877_v35 = vpop.f32.mrf.mxu1  ;;  %v1040_v38 = vmax.f32 %v976_v26, 0.0  ;;  %v1072_v39 = vmax.f32 %v1008_v27, 0.0 }
 0x107   :  { %1744 = vst [vmem:[%s2254_s3 + $0x30] sm:$0xff] %v1612_v30   ;;  %1760 = vst [vmem:[%s2254_s3 + $0xb0] sm:$0xff] %v1692_v31   ;;  %v977_v36 = vadd.f32 %v1845_v34, %v2089_v40  ;;  %v1009_v37 = vadd.f32 %v1877_v35, %v2089_v40  ;;  %v1038_v47 = vmax.f32 %v974_v32, 0.0 }
 0x108   :  { %v568_v41 = vpop.f32.mrf.mxu0  ;;  %v696_v42 = vpop.f32.mrf.mxu1  ;;  %v1070_v48 = vmax.f32 %v1006_v33, 0.0 }
 0x109   :  { %v1041_v43 = vmax.f32 %v977_v36, 0.0  ;;  %v1073_v44 = vmax.f32 %v1009_v37, 0.0  ;;  %v975_v45 = vadd.f32 %v2089_v40, %v568_v41  ;;  %v1007_v46 = vadd.f32 %v2089_v40, %v696_v42 }
 0x10a   :  { %v1848_v49 = vpop.f32.mrf.mxu0  ;;  %v1880_v50 = vpop.f32.mrf.mxu1 }
 0x10b   :  { %v1627_v51 = vpack.c.bf16 %v1041_v43, %v1040_v38  ;;  %v1707_v52 = vpack.c.bf16 %v1073_v44, %v1072_v39  ;;  %v1039_v53 = vmax.f32 %v975_v45, 0.0  ;;  %v1071_v54 = vmax.f32 %v1007_v46, 0.0 }
 0x10c   :  { %v980_v55 = vadd.f32 %v1848_v49, %v2089_v40  ;;  %v1012_v56 = vadd.f32 %v1880_v50, %v2089_v40  ;;  %v581_v57 = vpop.f32.mrf.mxu0  ;;  %v709_v58 = vpop.f32.mrf.mxu1 }
 0x10d   :  { %1747 = vst [vmem:[%s2254_s3 + $0x48] sm:$0xff] %v1627_v51   ;;  %1763 = vst [vmem:[%s2254_s3 + $0xc8] sm:$0xff] %v1707_v52   ;;  %v1622_v59 = vpack.c.bf16 %v1039_v53, %v1038_v47  ;;  %v1702_v60 = vpack.c.bf16 %v1071_v54, %v1070_v48  ;;  %v978_v61 = vadd.f32 %v2089_v40, %v581_v57 }
 0x10e   :  { %v1010_v62 = vadd.f32 %v2089_v40, %v709_v58  ;;  %v1849_v63 = vpop.f32.mrf.mxu0  ;;  %v1881_v0 = vpop.f32.mrf.mxu1  ;;  %v1044_v3 = vmax.f32 %v980_v55, 0.0  ;;  %v1076_v4 = vmax.f32 %v1012_v56, 0.0 }
 0x10f   :  { %1746 = vst [vmem:[%s2254_s3 + $0x40] sm:$0xff] %v1622_v59   ;;  %1762 = vst [vmem:[%s2254_s3 + $0xc0] sm:$0xff] %v1702_v60   ;;  %v981_v1 = vadd.f32 %v1849_v63, %v2089_v40  ;;  %v1013_v2 = vadd.f32 %v1881_v0, %v2089_v40  ;;  %v1042_v11 = vmax.f32 %v978_v61, 0.0 }
 0x110   :  { %v584_v5 = vpop.f32.mrf.mxu0  ;;  %v712_v6 = vpop.f32.mrf.mxu1  ;;  %v1074_v12 = vmax.f32 %v1010_v62, 0.0 }
 0x111   :  { %v1045_v7 = vmax.f32 %v981_v1, 0.0  ;;  %v1077_v8 = vmax.f32 %v1013_v2, 0.0  ;;  %v979_v9 = vadd.f32 %v2089_v40, %v584_v5  ;;  %v1011_v10 = vadd.f32 %v2089_v40, %v712_v6 }
 0x112   :  { %v1852_v13 = vpop.f32.mrf.mxu0  ;;  %v1884_v14 = vpop.f32.mrf.mxu1 }
 0x113   :  { %v1637_v15 = vpack.c.bf16 %v1045_v7, %v1044_v3  ;;  %v1717_v16 = vpack.c.bf16 %v1077_v8, %v1076_v4  ;;  %v1043_v17 = vmax.f32 %v979_v9, 0.0  ;;  %v1075_v18 = vmax.f32 %v1011_v10, 0.0 }
 0x114   :  { %v984_v19 = vadd.f32 %v1852_v13, %v2089_v40  ;;  %v1016_v20 = vadd.f32 %v1884_v14, %v2089_v40  ;;  %v597_v21 = vpop.f32.mrf.mxu0  ;;  %v725_v22 = vpop.f32.mrf.mxu1 }
 0x115   :  { %1749 = vst [vmem:[%s2254_s3 + $0x58] sm:$0xff] %v1637_v15   ;;  %1765 = vst [vmem:[%s2254_s3 + $0xd8] sm:$0xff] %v1717_v16   ;;  %v1632_v23 = vpack.c.bf16 %v1043_v17, %v1042_v11  ;;  %v1712_v24 = vpack.c.bf16 %v1075_v18, %v1074_v12  ;;  %v982_v25 = vadd.f32 %v2089_v40, %v597_v21 }
 0x116   :  { %v1014_v26 = vadd.f32 %v2089_v40, %v725_v22  ;;  %v1853_v27 = vpop.f32.mrf.mxu0  ;;  %v1885_v28 = vpop.f32.mrf.mxu1  ;;  %v1048_v31 = vmax.f32 %v984_v19, 0.0  ;;  %v1080_v32 = vmax.f32 %v1016_v20, 0.0 }
 0x117   :  { %1748 = vst [vmem:[%s2254_s3 + $0x50] sm:$0xff] %v1632_v23   ;;  %1764 = vst [vmem:[%s2254_s3 + $0xd0] sm:$0xff] %v1712_v24   ;;  %v985_v29 = vadd.f32 %v1853_v27, %v2089_v40  ;;  %v1017_v30 = vadd.f32 %v1885_v28, %v2089_v40  ;;  %v1046_v39 = vmax.f32 %v982_v25, 0.0 }
 0x118   :  { %v600_v33 = vpop.f32.mrf.mxu0  ;;  %v728_v34 = vpop.f32.mrf.mxu1  ;;  %v1078_v41 = vmax.f32 %v1014_v26, 0.0 }
 0x119   :  { %v1049_v35 = vmax.f32 %v985_v29, 0.0  ;;  %v1081_v36 = vmax.f32 %v1017_v30, 0.0  ;;  %v983_v37 = vadd.f32 %v2089_v40, %v600_v33  ;;  %v1015_v38 = vadd.f32 %v2089_v40, %v728_v34 }
 0x11a   :  { %v1856_v42 = vpop.f32.mrf.mxu0  ;;  %v1888_v43 = vpop.f32.mrf.mxu1 }
 0x11b   :  { %v1647_v44 = vpack.c.bf16 %v1049_v35, %v1048_v31  ;;  %v1727_v45 = vpack.c.bf16 %v1081_v36, %v1080_v32  ;;  %v1047_v46 = vmax.f32 %v983_v37, 0.0  ;;  %v1079_v47 = vmax.f32 %v1015_v38, 0.0 }
 0x11c   :  { %v988_v48 = vadd.f32 %v1856_v42, %v2089_v40  ;;  %v1020_v49 = vadd.f32 %v1888_v43, %v2089_v40  ;;  %v613_v50 = vpop.f32.mrf.mxu0  ;;  %v741_v51 = vpop.f32.mrf.mxu1 }
 0x11d   :  { %1751 = vst [vmem:[%s2254_s3 + $0x68] sm:$0xff] %v1647_v44   ;;  %1767 = vst [vmem:[%s2254_s3 + $0xe8] sm:$0xff] %v1727_v45   ;;  %v1642_v52 = vpack.c.bf16 %v1047_v46, %v1046_v39  ;;  %v1722_v53 = vpack.c.bf16 %v1079_v47, %v1078_v41  ;;  %v986_v54 = vadd.f32 %v2089_v40, %v613_v50 }
 0x11e   :  { %v1018_v55 = vadd.f32 %v2089_v40, %v741_v51  ;;  %v1857_v56 = vpop.f32.mrf.mxu0  ;;  %v1889_v57 = vpop.f32.mrf.mxu1  ;;  %v1052_v60 = vmax.f32 %v988_v48, 0.0  ;;  %v1084_v61 = vmax.f32 %v1020_v49, 0.0 }
 0x11f   :  { %1750 = vst [vmem:[%s2254_s3 + $0x60] sm:$0xff] %v1642_v52   ;;  %1766 = vst [vmem:[%s2254_s3 + $0xe0] sm:$0xff] %v1722_v53   ;;  %v989_v58 = vadd.f32 %v1857_v56, %v2089_v40  ;;  %v1021_v59 = vadd.f32 %v1889_v57, %v2089_v40  ;;  %v1050_v4 = vmax.f32 %v986_v54, 0.0 }
 0x120   :  { %v616_v62 = vpop.f32.mrf.mxu0  ;;  %v744_v63 = vpop.f32.mrf.mxu1  ;;  %v1082_v5 = vmax.f32 %v1018_v55, 0.0 }
 0x121   :  { %v1053_v0 = vmax.f32 %v989_v58, 0.0  ;;  %v1085_v1 = vmax.f32 %v1021_v59, 0.0  ;;  %v987_v2 = vadd.f32 %v2089_v40, %v616_v62  ;;  %v1019_v3 = vadd.f32 %v2089_v40, %v744_v63 }
 0x123   :  { %v1657_v6 = vpack.c.bf16 %v1053_v0, %v1052_v60  ;;  %v1737_v7 = vpack.c.bf16 %v1085_v1, %v1084_v61  ;;  %v1051_v8 = vmax.f32 %v987_v2, 0.0  ;;  %v1083_v9 = vmax.f32 %v1019_v3, 0.0 }
 0x125   :  { %1753 = vst [vmem:[%s2254_s3 + $0x78] sm:$0xff] %v1657_v6   ;;  %1769 = vst [vmem:[%s2254_s3 + $0xf8] sm:$0xff] %v1737_v7   ;;  %v1652_v10 = vpack.c.bf16 %v1051_v8, %v1050_v4  ;;  %v1732_v11 = vpack.c.bf16 %v1083_v9, %v1082_v5 }
 0x127   :  { %1752 = vst [vmem:[%s2254_s3 + $0x70] sm:$0xff] %v1652_v10   ;;  %1768 = vst [vmem:[%s2254_s3 + $0xf0] sm:$0xff] %v1732_v11  }

// kernel: resnet_bottleneck_forward.5
= control target key start
LH: loop header
LB: loop body
LE: loop exit
PB: predicated region body
PF: predicated region fallthrough
CT: control target
= control target key end

     0   :  { %s3127_s12 = smov 0   ;;  %s3129_s13 = smov 0   ;;  %s3738_s0 = inlined_call_operand.vmem [shape: bf16[2,360,128], index: 0, kind: input, shape index: {}]   ;;  %s3739_s1 = inlined_call_operand.vmem [shape: bf16[9,128,128], index: 1, kind: input, shape index: {}]   ;;  %s3740_s2 = inlined_call_operand.vmem [shape: f32[1,128], index: 2, kind: input, shape index: {}]   ;;  %s3741_s3 = inlined_call_operand.vmem [shape: bf16[2,72,128], index: 3, kind: output, shape index: {}]  }
   0x1   :  { %s3131_s14 = smov 0  }
   0x2 LB: > { %s25_s15 = sadd.s32 1, %s3099_s13  ;;  %p2203_p0 = scmp.ge.s32.totalorder %s3103_s14, 1  ;;  %s3103_s14 = sphi %s3131_s14, %s13_s14   ;;  %s3099_s13 = sphi %s3129_s13, %s3743_s13   ;;  %s3095_s12 = sphi %s3127_s12, %s3742_s12  }
   0x3   : > { %p27_p1 = scmp.ge.s32.totalorder %s25_s15, 2  ;;  %p168_p2 = scmp.lt.s32.totalorder %s3103_s14, 3 }
   0x5   : > { %s3745_s15 = smov (%p27_p1, %s25_s15), 0  ;;  %p169_p3 = pnand %p2203_p0, %p168_p2 }
   0x6   : > { %p202_p4 = scmp.lt.s32.totalorder (!%p169_p3), %s3095_s12, 1 }
   0x7   : > { %172 = sbr.rel (%p169_p3) target bundleno = 427 (0x1ab), region = 32 }
   0xc   : > { %v2972_v0 = vld [vmem:[%s3739_s1 + $0x78] sm:$0xff]   ;;  %v3105_v1 = vmov 0.0   ;;  %v2974_v3 = vld [vmem:[%s3739_s1 + $0x70] sm:$0xff]   ;;  %vm3106_vm0 = vmmov 0   ;;  %v2976_v5 = vld [vmem:[%s3739_s1 + $0x68] sm:$0xff]   ;;  %s3747_s12 = smov (!%p202_p4, %s3095_s12), 1 }
   0xd   : > { %2604 = vmatprep.subr.bf16.mxu0 %v3105_v1  ;;  %2640 = vmatprep.subr.bf16.mxu1 %v3105_v1  ;;  %v2973_v2 = vld [vmem:[%s3739_s1 + $0x38] sm:$0xff]   ;;  %v2975_v4 = vld [vmem:[%s3739_s1 + $0x30] sm:$0xff]   ;;  %v2977_v6 = vld [vmem:[%s3739_s1 + $0x28] sm:$0xff]   ;;  %s2944_s5 = smul.u32 180, %s3747_s12  ;;  %vm300_vm1 = vcmask 1046528   ;;  %vm861_vm3 = vcmask 1045504  }
   0xe   : > { %2605 = vmatpush3.bf16.msra.mxu0 %v2972_v0  ;;  %2620 = vmatprep.mubr.msk.bf16.mxu0 %vm3106_vm0, %v3105_v1  ;;  %v2978_v7 = vld [vmem:[%s3739_s1 + $0x60] sm:$0xff]   ;;  %v2980_v9 = vld [vmem:[%s3739_s1 + $0x58] sm:$0xff]   ;;  %v2982_v11 = vld [vmem:[%s3739_s1 + $0x50] sm:$0xff]   ;;  %vm635_vm2 = vsmask.f32 7424  ;;  %vm1057_vm4 = vcmask 1044480  }
   0xf   : > { %2641 = vmatpush3.bf16.msra.mxu1 %v2973_v2  ;;  %2606 = vmatprep.subr.bf16.mxu0 %v3105_v1  ;;  %v2979_v8 = vld [vmem:[%s3739_s1 + $0x20] sm:$0xff]   ;;  %v2981_v10 = vld [vmem:[%s3739_s1 + $0x18] sm:$0xff]   ;;  %s3198_s16 = scalar_lea.vmem %s3738_s0, %s2944_s5  ;;  %v2983_v12 = vld [vmem:[%s3739_s1 + $0x10] sm:$0xff]   ;;  %vm1222_vm5 = vsmask.f32 5376  ;;  %s2945_s5 = smul.u32 36, %s3747_s12 }
  0x10   : > { %2642 = vmatprep.subr.bf16.mxu1 %v3105_v1  ;;  %2656 = vmatprep.mubr.msk.bf16.mxu1 %vm3106_vm0, %v3105_v1  ;;  %v2984_v13 = vld [vmem:[%s3739_s1 + $0x48] sm:$0xff]   ;;  %v2989_v15 = vld [vmem:[%s3198_s16 + $0x34] sm:$0xff]   ;;  %v2986_v17 = vld [vmem:[%s3739_s1 + $0x40] sm:$0xff]   ;;  %vm1678_vm6 = vsmask.f32 6400 }
  0x11   : > { %v2988_v14 = vld [vmem:[%s3198_s16 + $0x2c] sm:$0xfe]   ;;  %v302_v19 = vrot.slane %v2989_v15, 1  ;;  %v2987_v20 = vld [vmem:[%s3739_s1] sm:$0xff]   ;;  %v2991_v22 = vld [vmem:[%s3739_s1 + $0xb8] sm:$0xff]   ;;  %s3710_s12 = scalar_lea.vmem %s3741_s3, %s2945_s5 }
  0x12   : > { %2607 = vmatpush3.bf16.msra.mxu0 %v2974_v3  ;;  %v2985_v16 = vld [vmem:[%s3739_s1 + $0x8] sm:$0xff]   ;;  %v301_v18 = vrot.slane %v2988_v14, 1  ;;  %v2990_v21 = vld [vmem:[%s3198_s16] sm:$0xff]   ;;  %v2995_v25 = vld [vmem:[%s3739_s1 + $0xf8] sm:$0xff]  }
  0x13   : > { %2643 = vmatpush3.bf16.msra.mxu1 %v2975_v4  ;;  %2608 = vmatprep.subr.bf16.mxu0 %v3105_v1  ;;  %v2993_v24 = vld [vmem:[%s3198_s16 + $0x3c] sm:$0xff]   ;;  %v2992_v26 = vld [vmem:[%s3739_s1 + $0xb0] sm:$0xff]   ;;  %v2998_v29 = vld [vmem:[%s3198_s16 + $0x44] sm:$0xff]  }
  0x14   : > { %2644 = vmatprep.subr.bf16.mxu1 %v3105_v1  ;;  %v303_v23 = vsel %vm300_vm1, %v301_v18, %v302_v19  ;;  %v304_v27 = vrot.slane %v2993_v24, 1  ;;  %v2997_v28 = vld [vmem:[%s3739_s1 + $0xf0] sm:$0xff]   ;;  %v2994_v31 = vld [vmem:[%s3198_s16 + $0x8] sm:$0xff]   ;;  %v306_v34 = vrot.slane %v2998_v29, 1  ;;  %v3000_v35 = vld [vmem:[%s3739_s1 + $0xa0] sm:$0xff]  }
  0x15   : > { %v2996_v32 = vld [vmem:[%s3739_s1 + $0xa8] sm:$0xff]   ;;  %v3003_v36 = vld [vmem:[%s3739_s1 + $0xe0] sm:$0xff]   ;;  %v2999_v37 = vld [vmem:[%s3198_s16 + $0x10] sm:$0xff]  }
  0x16   : > { %2609 = vmatpush3.bf16.msra.mxu0 %v2976_v5  ;;  %v305_v30 = vsel %vm300_vm1, %v302_v19, %v304_v27  ;;  %v3001_v33 = vld [vmem:[%s3739_s1 + $0xe8] sm:$0xff]   ;;  %v3002_v38 = vld [vmem:[%s3739_s1 + $0x98] sm:$0xff]   ;;  %v307_v39 = vsel %vm300_vm1, %v304_v27, %v306_v34  ;;  %v3007_v43 = vld [vmem:[%s3739_s1 + $0x90] sm:$0xff]  }
  0x17   : > { %2645 = vmatpush3.bf16.msra.mxu1 %v2977_v6  ;;  %2610 = vmatprep.subr.bf16.mxu0 %v3105_v1  ;;  %v3004_v40 = vld [vmem:[%s3198_s16 + $0x4c] sm:$0x1f]   ;;  %v3006_v41 = vld [vmem:[%s3739_s1 + $0xd8] sm:$0xff]   ;;  %v3014_v47 = vld [vmem:[%s3198_s16] sm:$0xff]  }
  0x18   : > { %2646 = vmatprep.subr.bf16.mxu1 %v3105_v1  ;;  %v308_v42 = vrot.slane %v3004_v40, 1  ;;  %v3008_v44 = vld [vmem:[%s3739_s1 + $0xd0] sm:$0xff]   ;;  %v3005_v45 = vld [vmem:[%s3198_s16 + $0x18] sm:$0xff]   ;;  %v3009_v48 = vld [vmem:[%s3739_s1 + $0x88] sm:$0xff]   ;;  %v639_v51 = vshll.u32 %v3014_v47, 16  ;;  %v637_v55 = vshrl.u32 %v3014_v47, 16 }
  0x19   : > { %v3011_v49 = vld [vmem:[%s3739_s1 + $0xc8] sm:$0xff]   ;;  %v3012_v52 = vld [vmem:[%s3739_s1 + $0x80] sm:$0xff]   ;;  %v3325_v59 = vld [vmem:[%s3198_s16 + $0x58] sm:$0xfc]  }
  0x1a   : > { %2611 = vmatpush3.bf16.msra.mxu0 %v2978_v7  ;;  %v309_v46 = vsel %vm300_vm1, %v306_v34, %v308_v42  ;;  %v3015_v50 = vld [vmem:[%s3198_s16 + $0x8] sm:$0xff]   ;;  %v3013_v53 = vld [vmem:[%s3739_s1 + $0xc0] sm:$0xff]   ;;  %v641_v57 = vrot.slane %v639_v51, 1  ;;  %v3020_v62 = vld [vmem:[%s3198_s16 + $0x10] sm:$0xff]   ;;  %v862_v63 = vrot.slane %v3325_v59, 2  ;;  %v1224_v47 = vshrl.u32 %v3325_v59, 16 }
  0x1b   : > { %2647 = vmatpush3.bf16.msra.mxu1 %v2979_v8  ;;  %2612 = vmatprep.subr.bf16.mxu0 %v3105_v1  ;;  %v3010_v54 = vld [vmem:[%s3198_s16 + $0x20] ss:$0 sps:$4 sm:$0xff]   ;;  %v644_v56 = vshll.u32 %v3015_v50, 16  ;;  %v3018_v3 = vld [vmem:[%s3739_s1 + $0x138] sm:$0xff]   ;;  %v648_v4 = vshrl.u32 %v3015_v50, 16  ;;  %v652_v5 = vshll.u32 %v3020_v62, 16 }
  0x1c   : > { %2648 = vmatprep.subr.bf16.mxu1 %v3105_v1  ;;  %v3322_v58 = vld [vmem:[%s3198_s16 + $0x60] sm:$0xff]   ;;  %v642_v60 = vor.u32 %v641_v57, %v637_v55  ;;  %v3341_v6 = vld [vmem:[%s3198_s16 + $0x68] sm:$0xff]   ;;  %v3022_v8 = vld [vmem:[%s3739_s1 + $0x178] sm:$0xff]   ;;  %v656_v18 = vshrl.u32 %v3020_v62, 16 }
  0x1d   : > { %v646_v61 = vrot.slane %v644_v56, 1  ;;  %v863_v0 = vrot.slane %v3322_v58, 2  ;;  %v3024_v14 = vld [vmem:[%s3739_s1 + $0x170] sm:$0xff]   ;;  %v3030_v27 = vld [vmem:[%s3739_s1 + $0x160] sm:$0xff]   ;;  %v818_v29 = vld [vmem:[%s3198_s16 + $0x7c] sm:$0x3] }
  0x1e   : > { %2613 = vmatpush3.bf16.msra.mxu0 %v2980_v9  ;;  %v3025_v9 = vld [vmem:[%s3198_s16 + $0x18] sm:$0xff]   ;;  %v1232_v50 = vshrl.u32 %v3322_v58, 16  ;;  %v1235_v51 = vshll.u32 %v3322_v58, 16  ;;  %v3041_v55 = vld [vmem:[%s3198_s16 + $0x84] sm:$0xf8]   ;;  %v3042_v56 = vld [vmem:[%s3198_s16 + $0x8c] sm:$0xff]  }
  0x1f   : > { %2649 = vmatpush3.bf16.msra.mxu1 %v2981_v10  ;;  %2614 = vmatprep.subr.bf16.mxu0 %v3105_v1  ;;  %v647_v2 = vsel %vm635_vm2, %v642_v60, %v646_v61  ;;  %v864_v7 = vsel %vm861_vm3, %v862_v63, %v863_v0  ;;  %v3019_v10 = vld [vmem:[%s3739_s1 + $0x130] sm:$0xff]   ;;  %v660_v15 = vshll.u32 %v3025_v9, 16  ;;  %v1058_v58 = vrot.slane %v3041_v55, 3 }
  0x20   : > { %2650 = vmatprep.subr.bf16.mxu1 %v3105_v1  ;;  %v1237_v60 = vrot.slane %v1235_v51, 3  ;;  %v3542_v51 = vld [vmem:[%s3198_s16 + $0xc] sm:$0xff]  }
  0x22   : > { %2615 = vmatpush3.bf16.msra.mxu0 %v2982_v11  ;;  %v650_v11 = vor.u32 %v648_v4, %v646_v61  ;;  %v1059_v61 = vrot.slane %v3042_v56, 3  ;;  %v3045_v4 = vld [vmem:[%s3198_s16 + $0x94] sm:$0xff]  }
  0x23   : > { %2651 = vmatpush3.bf16.msra.mxu1 %v2983_v12  ;;  %2616 = vmatprep.subr.bf16.mxu0 %v3105_v1  ;;  %v654_v12 = vrot.slane %v652_v5, 1 }
  0x24   : > { %2652 = vmatprep.subr.bf16.mxu1 %v3105_v1  ;;  %v1060_v5 = vsel %vm1057_vm4, %v1058_v58, %v1059_v61 }
  0x25   : > { %v658_v24 = vor.u32 %v656_v18, %v654_v12  ;;  %v3047_v18 = vld [vmem:[%s3739_s1 + $0x1a8] sm:$0xff]  }
  0x26   : > { %2617 = vmatpush3.bf16.msra.mxu0 %v2984_v13  ;;  %v865_v13 = vrot.slane %v3341_v6, 2 }
  0x27   : > { %2653 = vmatpush3.bf16.msra.mxu1 %v2985_v16  ;;  %2618 = vmatprep.subr.bf16.mxu0 %v3105_v1  ;;  %v655_v16 = vsel %vm635_vm2, %v650_v11, %v654_v12  ;;  %v1061_v11 = vrot.slane %v3045_v4, 3 }
  0x28   : > { %2654 = vmatprep.subr.bf16.mxu1 %v3105_v1  ;;  %v866_v19 = vsel %vm861_vm3, %v863_v0, %v865_v13  ;;  %v1241_v0 = vshrl.u32 %v3341_v6, 16 }
  0x2a   : > { %2619 = vmatpush3.bf16.msra.mxu0 %v2986_v17  ;;  %v3023_v17 = vld [vmem:[%s3739_s1 + $0x128] sm:$0xff]  }
  0x2b   : > { %2655 = vmatpush3.bf16.msra.mxu1 %v2987_v20  ;;  %2676 = vmatprep.subr.bf16.mxu0 %v3105_v1  ;;  %v3368_v20 = vld [vmem:[%s3198_s16 + $0x70] sm:$0xff]  }
  0x2c   : > { %2712 = vmatprep.subr.bf16.mxu1 %v3105_v1 }
  0x2d   : > { %2621 = vmatmul.mubr.bf16.vlgmr.msra.gmra.mxu0 %v303_v23  ;;  %v3028_v23 = vld [vmem:[%s3739_s1 + $0x168] sm:$0xff]  }
  0x2e   : > { %2657 = vmatmul.mubr.bf16.vlgmr.msra.gmra.mxu1 %v2990_v21  ;;  %2677 = vmatpush3.bf16.msra.mxu0 %v2991_v22  ;;  %v662_v21 = vrot.slane %v660_v15, 1  ;;  %v3027_v22 = vld [vmem:[%s3739_s1 + $0x120] sm:$0xff]   ;;  %v1201_v15 = vld [vmem:[%s3198_s16 + $0x7c] sm:$0x7] }
  0x2f   : > { %2678 = vmatprep.subr.bf16.mxu0 %v3105_v1  ;;  %2624 = vmatprep.mubr.msk.bf16.mxu0 %vm3106_vm0, %v3105_v1 }
  0x30   : > { %2660 = vmatprep.mubr.msk.bf16.mxu1 %vm3106_vm0, %v3105_v1  ;;  %2713 = vmatpush3.bf16.msra.mxu1 %v2995_v25  ;;  %v3031_v25 = vld [vmem:[%s3198_s16 + $0x20] sm:$0x1f]  }
  0x31   : > { %2714 = vmatprep.subr.bf16.mxu1 %v3105_v1 }
  0x32   : > { %2679 = vmatpush3.bf16.msra.mxu0 %v2992_v26  ;;  %v867_v26 = vrot.slane %v3368_v20, 2 }
  0x33   : > { %2680 = vmatprep.subr.bf16.mxu0 %v3105_v1 }
  0x34   : > { %2715 = vmatpush3.bf16.msra.mxu1 %v2997_v28  ;;  %v3387_v28 = vld [vmem:[%s3198_s16 + $0x78] sm:$0xf]  ;;  %v868_v34 = vsel %vm861_vm3, %v865_v13, %v867_v26  ;;  %v1250_v13 = vshrl.u32 %v3368_v20, 16 }
  0x35   : > { %2625 = vmatmul.mubr.bf16.gmra.mxu0 %v305_v30  ;;  %2716 = vmatprep.subr.bf16.mxu1 %v3105_v1  ;;  %v3029_v30 = vld [vmem:[%s3739_s1 + $0x118] sm:$0xff]  }
  0x36   : > { %2661 = vmatmul.mubr.bf16.gmra.mxu1 %v2994_v31  ;;  %2681 = vmatpush3.bf16.msra.mxu0 %v2996_v32  ;;  %v663_v31 = vsel %vm635_vm2, %v658_v24, %v662_v21  ;;  %v664_v32 = vshrl.u32 %v3025_v9, 16  ;;  %v3051_v24 = vld [vmem:[%s3739_s1 + $0x1e8] sm:$0xff]  }
  0x37   : > { %2628 = vmatprep.mubr.msk.bf16.mxu0 %vm3106_vm0, %v3105_v1  ;;  %2664 = vmatprep.mubr.msk.bf16.mxu1 %vm3106_vm0, %v3105_v1 }
  0x38   : > { %2682 = vmatprep.subr.bf16.mxu0 %v3105_v1  ;;  %2717 = vmatpush3.bf16.msra.mxu1 %v3001_v33  ;;  %v668_v33 = vshll.u32 %v3031_v25, 16 }
  0x39   : > { %2718 = vmatprep.subr.bf16.mxu1 %v3105_v1 }
  0x3a   : > { %2683 = vmatpush3.bf16.msra.mxu0 %v3000_v35  ;;  %v2297_v35 = vcombine.low %v3387_v28, %v818_v29 }
  0x3b   : > { %2684 = vmatprep.subr.bf16.mxu0 %v3105_v1 }
  0x3c   : > { %2719 = vmatpush3.bf16.msra.mxu1 %v3003_v36  ;;  %v3034_v36 = vld [vmem:[%s3739_s1 + $0x158] sm:$0xff]   ;;  %v869_v40 = vrot.slane %v2297_v35, 2 }
  0x3d   : > { %2629 = vmatmul.mubr.bf16.gmra.mxu0 %v307_v39  ;;  %2720 = vmatprep.subr.bf16.mxu1 %v3105_v1  ;;  %v3035_v39 = vld [vmem:[%s3739_s1 + $0x110] sm:$0xff]  }
  0x3e   : > { %2665 = vmatmul.mubr.bf16.gmra.mxu1 %v2999_v37  ;;  %2685 = vmatpush3.bf16.msra.mxu0 %v3002_v38  ;;  %v666_v37 = vor.u32 %v664_v32, %v662_v21  ;;  %v670_v38 = vrot.slane %v668_v33, 1  ;;  %v3052_v32 = vld [vmem:[%s3739_s1 + $0x198] sm:$0xff]   ;;  %v3054_v33 = vld [vmem:[%s3198_s16 + $0xa4] sm:$0x7f]  }
  0x3f   : > { %2632 = vmatprep.mubr.msk.bf16.mxu0 %vm3106_vm0, %v3105_v1  ;;  %2668 = vmatprep.mubr.msk.bf16.mxu1 %vm3106_vm0, %v3105_v1 }
  0x40   : > { %2686 = vmatprep.subr.bf16.mxu0 %v3105_v1  ;;  %2721 = vmatpush3.bf16.msra.mxu1 %v3006_v41  ;;  %v3036_v41 = vld [vmem:[%s3739_s1 + $0x150] sm:$0xff]  }
  0x41   : > { %2722 = vmatprep.subr.bf16.mxu1 %v3105_v1 }
  0x42   : > { %2687 = vmatpush3.bf16.msra.mxu0 %v3007_v43  ;;  %v870_v43 = vsel %vm861_vm3, %v867_v26, %v869_v40  ;;  %v3050_v26 = vld [vmem:[%s3739_s1 + $0x1a0] sm:$0xff]  }
  0x43   : > { %2688 = vmatprep.subr.bf16.mxu0 %v3105_v1 }
  0x44   : > { %2723 = vmatpush3.bf16.msra.mxu1 %v3008_v44  ;;  %v3037_v44 = vld [vmem:[%s3739_s1 + $0x108] sm:$0xff]  }
  0x45   : > { %2633 = vmatmul.mubr.bf16.gmra.mxu0 %v309_v46  ;;  %2724 = vmatprep.subr.bf16.mxu1 %v3105_v1  ;;  %v672_v46 = vshrl.u32 %v3031_v25, 16 }
  0x46   : > { %2669 = vmatmul.mubr.bf16.gmra.mxu1 %v3005_v45  ;;  %2636 = vmatprep.mubr.msk.bf16.mxu0 %vm3106_vm0, %v3105_v1  ;;  %v3038_v45 = vld [vmem:[%s3739_s1 + $0x148] sm:$0xff]  }
  0x47   : > { %2672 = vmatprep.mubr.msk.bf16.mxu1 %vm3106_vm0, %v3105_v1  ;;  %2689 = vmatpush3.bf16.msra.mxu0 %v3009_v48  ;;  %v1227_v48 = vshll.u32 %v3325_v59, 16  ;;  %v1234_v59 = vrot.slane %v1232_v50, 2  ;;  %v3059_v50 = vld [vmem:[%s3739_s1 + $0x1c8] sm:$0xff]  }
  0x48   : > { %2725 = vmatpush3.bf16.msra.mxu1 %v3011_v49  ;;  %2690 = vmatprep.subr.bf16.mxu0 %v3105_v1  ;;  %v3039_v49 = vld [vmem:[%s3739_s1 + $0x100] sm:$0xff]  }
  0x49   : > { %2726 = vmatprep.subr.bf16.mxu1 %v3105_v1  ;;  %v1229_v57 = vrot.slane %v1227_v48, 3  ;;  %v1238_v63 = vor.u32 %v1237_v60, %v1234_v59  ;;  %v3064_v48 = vld [vmem:[%s3198_s16 + $0x30] sm:$0xfe]   ;;  %v3061_v59 = vld [vmem:[%s3739_s1 + $0x1c0] sm:$0xff]  }
  0x4a   : > { %v1683_v55 = vshll.u32 %v3064_v48, 16 }
  0x4b   : > { %2691 = vmatpush3.bf16.msra.mxu0 %v3012_v52  ;;  %v3040_v52 = vld [vmem:[%s3739_s1 + $0x140] sm:$0xff]  }
  0x4c   : > { %2727 = vmatpush3.bf16.msra.mxu1 %v3013_v53  ;;  %2748 = vmatprep.subr.bf16.mxu0 %v3105_v1  ;;  %v674_v53 = vor.u32 %v672_v46, %v670_v38 }
  0x4d   : > { %2637 = vmatmul.mubr.bf16.gmra.mxu0 %v308_v42  ;;  %2784 = vmatprep.subr.bf16.mxu1 %v3105_v1  ;;  %v671_v42 = vsel %vm635_vm2, %v666_v37, %v670_v38  ;;  %v3055_v37 = vld [vmem:[%s3739_s1 + $0x1d8] sm:$0xff]   ;;  %v1065_v38 = vrot.slane %v3054_v33, 3  ;;  %v3076_v33 = vld [vmem:[%s3198_s16 + $0x50] sm:$0x3f]  }
  0x4e   : > { %2673 = vmatmul.mubr.bf16.gmra.mxu1 %v3010_v54  ;;  %2692 = vmatprep.mubr.msk.bf16.mxu0 %vm3106_vm0, %v3105_v1  ;;  %v1226_v54 = vrot.slane %v1224_v47, 2  ;;  %v3058_v47 = vld [vmem:[%s3739_s1 + $0x188] sm:$0xff]  }
  0x4f   : > { %2728 = vmatprep.mubr.msk.bf16.mxu1 %vm3106_vm0, %v3105_v1 }
  0x50   : > { %v1230_v62 = vor.u32 %v1229_v57, %v1226_v54  ;;  %v1680_v54 = vshrl.u32 %v3064_v48, 16 }
  0x55   : > { %2693 = vmatmul.mubr.bf16.vlgmr.msra.gmra.mxu0 %v647_v2  ;;  %v1244_v2 = vshll.u32 %v3341_v6, 16  ;;  %v3044_v6 = vld [vmem:[%s3739_s1 + $0x1b0] sm:$0xff]  }
  0x56   : > { %2729 = vmatmul.mubr.bf16.vlgmr.msra.gmra.mxu1 %v864_v7  ;;  %2749 = vmatpush3.bf16.msra.mxu0 %v3018_v3  ;;  %v3043_v3 = vld [vmem:[%s3739_s1 + $0x1b8] sm:$0xff]   ;;  %v1239_v7 = vsel %vm1222_vm5, %v1230_v62, %v1238_v63  ;;  %v1682_v62 = vrot.slane %v1680_v54, 1 }
  0x57   : > { %2750 = vmatprep.subr.bf16.mxu0 %v3105_v1  ;;  %2696 = vmatprep.mubr.msk.bf16.mxu0 %vm3106_vm0, %v3105_v1  ;;  %v1246_v9 = vrot.slane %v1244_v2, 3 }
  0x58   : > { %2732 = vmatprep.mubr.msk.bf16.mxu1 %vm3106_vm0, %v3105_v1  ;;  %2785 = vmatpush3.bf16.msra.mxu1 %v3022_v8  ;;  %v1243_v8 = vrot.slane %v1241_v0, 2 }
  0x59   : > { %2786 = vmatprep.subr.bf16.mxu1 %v3105_v1 }
  0x5a   : > { %2751 = vmatpush3.bf16.msra.mxu0 %v3019_v10  ;;  %v3046_v10 = vld [vmem:[%s3739_s1 + $0x1f8] sm:$0xff]   ;;  %v1247_v12 = vor.u32 %v1246_v9, %v1243_v8 }
  0x5b   : > { %2752 = vmatprep.subr.bf16.mxu0 %v3105_v1 }
  0x5c   : > { %2787 = vmatpush3.bf16.msra.mxu1 %v3024_v14  ;;  %v1253_v14 = vshll.u32 %v3368_v20, 16  ;;  %v2351_v20 = vcombine.low %v3387_v28, %v1201_v15  ;;  %v1248_v21 = vsel %vm1222_vm5, %v1238_v63, %v1247_v12  ;;  %v1685_v63 = vrot.slane %v1683_v55, 2 }
  0x5d   : > { %2697 = vmatmul.mubr.bf16.gmra.mxu0 %v655_v16  ;;  %2788 = vmatprep.subr.bf16.mxu1 %v3105_v1  ;;  %v3048_v16 = vld [vmem:[%s3739_s1 + $0x1f0] sm:$0xff]  }
  0x5e   : > { %2733 = vmatmul.mubr.bf16.gmra.mxu1 %v866_v19  ;;  %2753 = vmatpush3.bf16.msra.mxu0 %v3023_v17  ;;  %v1062_v17 = vsel %vm1057_vm4, %v1059_v61, %v1061_v11  ;;  %v3049_v19 = vld [vmem:[%s3198_s16 + $0x9c] sm:$0xff]   ;;  %v1259_v28 = vshrl.u32 %v2351_v20, 16  ;;  %v1262_v29 = vshll.u32 %v2351_v20, 16  ;;  %v1461_v61 = vshll.u32 %v3542_v51, 16 }
  0x5f   : > { %2700 = vmatprep.mubr.msk.bf16.mxu0 %vm3106_vm0, %v3105_v1  ;;  %2736 = vmatprep.mubr.msk.bf16.mxu1 %vm3106_vm0, %v3105_v1  ;;  %v1063_v25 = vrot.slane %v3049_v19, 3  ;;  %v1686_v8 = vor.u32 %v1685_v63, %v1682_v62  ;;  %v3067_v19 = vld [vmem:[%s3739_s1 + $0x230] sm:$0xff]   ;;  %v1879_v63 = vrot.slane %v3542_v51, 1 }
  0x60   : > { %2754 = vmatprep.subr.bf16.mxu0 %v3105_v1  ;;  %2789 = vmatpush3.bf16.msra.mxu1 %v3028_v23  ;;  %v1255_v23 = vrot.slane %v1253_v14, 3  ;;  %v1261_v35 = vrot.slane %v1259_v28, 2 }
  0x61   : > { %2790 = vmatprep.subr.bf16.mxu1 %v3105_v1 }
  0x62   : > { %2755 = vmatpush3.bf16.msra.mxu0 %v3027_v22  ;;  %v1252_v22 = vrot.slane %v1250_v13, 2  ;;  %v1465_v13 = vshrl.u32 %v3542_v51, 16 }
  0x63   : > { %2756 = vmatprep.subr.bf16.mxu0 %v3105_v1 }
  0x64   : > { %2791 = vmatpush3.bf16.msra.mxu1 %v3030_v27  ;;  %v1256_v27 = vor.u32 %v1255_v23, %v1252_v22  ;;  %v3577_v22 = vld [vmem:[%s3198_s16 + $0x1c] sm:$0xff]  }
  0x65   : > { %2701 = vmatmul.mubr.bf16.gmra.mxu0 %v663_v31  ;;  %2792 = vmatprep.subr.bf16.mxu1 %v3105_v1  ;;  %v1064_v31 = vsel %vm1057_vm4, %v1061_v11, %v1063_v25 }
  0x66   : > { %2737 = vmatmul.mubr.bf16.gmra.mxu1 %v868_v34  ;;  %2757 = vmatpush3.bf16.msra.mxu0 %v3029_v30  ;;  %v3053_v30 = vld [vmem:[%s3739_s1 + $0x1e0] sm:$0xff]   ;;  %v1257_v34 = vsel %vm1222_vm5, %v1247_v12, %v1256_v27  ;;  %v3066_v12 = vld [vmem:[%s3739_s1 + $0x238] sm:$0xff]  }
  0x67   : > { %2704 = vmatprep.mubr.msk.bf16.mxu0 %vm3106_vm0, %v3105_v1  ;;  %2740 = vmatprep.mubr.msk.bf16.mxu1 %vm3106_vm0, %v3105_v1 }
  0x68   : > { %2758 = vmatprep.subr.bf16.mxu0 %v3105_v1  ;;  %2793 = vmatpush3.bf16.msra.mxu1 %v3034_v36  ;;  %v1264_v36 = vrot.slane %v1262_v29, 3  ;;  %v1477_v29 = vshll.u32 %v3577_v22, 16 }
  0x69   : > { %2794 = vmatprep.subr.bf16.mxu1 %v3105_v1 }
  0x6a   : > { %2759 = vmatpush3.bf16.msra.mxu0 %v3035_v39  ;;  %v3056_v39 = vld [vmem:[%s3739_s1 + $0x190] sm:$0xff]  }
  0x6b   : > { %2760 = vmatprep.subr.bf16.mxu0 %v3105_v1 }
  0x6c   : > { %2795 = vmatpush3.bf16.msra.mxu1 %v3036_v41  ;;  %v1401_v41 = vld [vmem:[%s3198_s16 + $0x4] sm:$0xf] }
  0x6d   : > { %2705 = vmatmul.mubr.bf16.gmra.mxu0 %v671_v42  ;;  %2796 = vmatprep.subr.bf16.mxu1 %v3105_v1  ;;  %v3519_v42 = vld [vmem:[%s3198_s16 + $0x8] sm:$0xf] }
  0x6e   : > { %2741 = vmatmul.mubr.bf16.gmra.mxu1 %v870_v43  ;;  %2708 = vmatprep.mubr.msk.bf16.mxu0 %vm3106_vm0, %v3105_v1  ;;  %v3057_v43 = vld [vmem:[%s3739_s1 + $0x1d0] sm:$0xff]  }
  0x6f   : > { %2744 = vmatprep.mubr.msk.bf16.mxu1 %vm3106_vm0, %v3105_v1  ;;  %2761 = vmatpush3.bf16.msra.mxu0 %v3037_v44  ;;  %v1066_v44 = vsel %vm1057_vm4, %v1063_v25, %v1065_v38 }
  0x70   : > { %2797 = vmatpush3.bf16.msra.mxu1 %v3038_v45  ;;  %2762 = vmatprep.subr.bf16.mxu0 %v3105_v1  ;;  %v2376_v45 = vcombine.low %v1401_v41, %v3519_v42 }
  0x71   : > { %2798 = vmatprep.subr.bf16.mxu1 %v3105_v1 }
  0x72   : > { %v1454_v60 = vshrl.u32 %v2376_v45, 16 }
  0x73   : > { %2763 = vmatpush3.bf16.msra.mxu0 %v3039_v49  ;;  %v3065_v49 = vld [vmem:[%s3198_s16 + $0x38] sm:$0xff]  }
  0x74   : > { %2799 = vmatpush3.bf16.msra.mxu1 %v3040_v52  ;;  %2820 = vmatprep.subr.bf16.mxu0 %v3105_v1  ;;  %v1456_v52 = vshll.u32 %v2376_v45, 16  ;;  %v1688_v56 = vshrl.u32 %v3065_v49, 16  ;;  %v1691_v57 = vshll.u32 %v3065_v49, 16 }
  0x75   : > { %2709 = vmatmul.mubr.bf16.gmra.mxu0 %v674_v53  ;;  %2856 = vmatprep.subr.bf16.mxu1 %v3105_v1  ;;  %v3060_v53 = vld [vmem:[%s3739_s1 + $0x180] sm:$0xff]  }
  0x76   : > { %2745 = vmatmul.mubr.bf16.gmra.mxu1 %v869_v40  ;;  %2764 = vmatprep.mubr.msk.bf16.mxu0 %vm3106_vm0, %v3105_v1  ;;  %v1265_v40 = vor.u32 %v1264_v36, %v1261_v35  ;;  %v1458_v58 = vrot.slane %v1456_v52, 1  ;;  %v1690_v0 = vrot.slane %v1688_v56, 1  ;;  %v1693_v2 = vrot.slane %v1691_v57, 2  ;;  %v3073_v36 = vld [vmem:[%s3739_s1 + $0x220] sm:$0xff]   ;;  %v3077_v52 = vld [vmem:[%s3739_s1 + $0x210] sm:$0xff]   ;;  %v3078_v56 = vld [vmem:[%s3739_s1 + $0x208] sm:$0xff]  }
  0x77   : > { %2800 = vmatprep.mubr.msk.bf16.mxu1 %vm3106_vm0, %v3105_v1  ;;  %v1479_v35 = vrot.slane %v1477_v29, 1 }
  0x78   : > { %v1266_v46 = vsel %vm1222_vm5, %v1256_v27, %v1265_v40  ;;  %v1459_v4 = vor.u32 %v1458_v58, %v1454_v60  ;;  %v1694_v9 = vor.u32 %v1693_v2, %v1690_v0  ;;  %v3070_v27 = vld [vmem:[%s3739_s1 + $0x228] sm:$0xff]   ;;  %v1857_v60 = vld [vmem:[%s3198_s16 + $0x4] sm:$0xe]  ;;  %v1883_v0 = vrot.slane %v3577_v22, 1 }
  0x7a   : > { %v1695_v15 = vsel %vm1678_vm6, %v1686_v8, %v1694_v9 }
  0x7d   : > { %2765 = vmatmul.mubr.bf16.vlgmr.msra.gmra.mxu0 %v1060_v5  ;;  %v1463_v5 = vrot.slane %v1461_v61, 1  ;;  %v2434_v61 = vcombine.low %v1857_v60, %v3519_v42 }
  0x7e   : > { %2801 = vmatmul.mubr.bf16.vlgmr.msra.gmra.mxu1 %v1239_v7  ;;  %2821 = vmatpush3.bf16.msra.mxu0 %v3043_v3  ;;  %v3069_v3 = vld [vmem:[%s3198_s16 + $0x40] sm:$0xff]   ;;  %v3561_v7 = vld [vmem:[%s3198_s16 + $0x14] sm:$0xff]  }
  0x7f   : > { %2822 = vmatprep.subr.bf16.mxu0 %v3105_v1  ;;  %2768 = vmatprep.mubr.msk.bf16.mxu0 %vm3106_vm0, %v3105_v1  ;;  %v1464_v11 = vsel %vm635_vm2, %v1459_v4, %v1463_v5  ;;  %v1469_v14 = vshll.u32 %v3561_v7, 16  ;;  %v1467_v20 = vor.u32 %v1465_v13, %v1463_v5  ;;  %v1473_v28 = vshrl.u32 %v3561_v7, 16 }
  0x80   : > { %2804 = vmatprep.mubr.msk.bf16.mxu1 %vm3106_vm0, %v3105_v1  ;;  %2857 = vmatpush3.bf16.msra.mxu1 %v3046_v10  ;;  %v1697_v10 = vshrl.u32 %v3069_v3, 16  ;;  %v1878_v62 = vrot.slane %v2434_v61, 1  ;;  %v1881_v4 = vrot.slane %v3561_v7, 1 }
  0x81   : > { %2858 = vmatprep.subr.bf16.mxu1 %v3105_v1 }
  0x82   : > { %2823 = vmatpush3.bf16.msra.mxu0 %v3044_v6  ;;  %v1700_v6 = vshll.u32 %v3069_v3, 16  ;;  %v1880_v3 = vsel %vm300_vm1, %v1878_v62, %v1879_v63  ;;  %v1882_v51 = vsel %vm300_vm1, %v1879_v63, %v1881_v4  ;;  %v1884_v5 = vsel %vm300_vm1, %v1881_v4, %v1883_v0 }
  0x83   : > { %2824 = vmatprep.subr.bf16.mxu0 %v3105_v1 }
  0x84   : > { %2859 = vmatpush3.bf16.msra.mxu1 %v3048_v16  ;;  %v1699_v16 = vrot.slane %v1697_v10, 1 }
  0x85   : > { %2769 = vmatmul.mubr.bf16.gmra.mxu0 %v1062_v17  ;;  %2860 = vmatprep.subr.bf16.mxu1 %v3105_v1  ;;  %v1702_v17 = vrot.slane %v1700_v6, 2 }
  0x86   : > { %2805 = vmatmul.mubr.bf16.gmra.mxu1 %v1248_v21  ;;  %2825 = vmatpush3.bf16.msra.mxu0 %v3047_v18  ;;  %v3072_v18 = vld [vmem:[%s3198_s16 + $0x48] sm:$0xff]   ;;  %v1471_v21 = vrot.slane %v1469_v14, 1 }
  0x87   : > { %2772 = vmatprep.mubr.msk.bf16.mxu0 %vm3106_vm0, %v3105_v1  ;;  %2808 = vmatprep.mubr.msk.bf16.mxu1 %vm3106_vm0, %v3105_v1  ;;  %v1703_v23 = vor.u32 %v1702_v17, %v1699_v16  ;;  %v1709_v25 = vshll.u32 %v3072_v18, 16 }
  0x88   : > { %2826 = vmatprep.subr.bf16.mxu0 %v3105_v1  ;;  %2861 = vmatpush3.bf16.msra.mxu1 %v3051_v24  ;;  %v1706_v24 = vshrl.u32 %v3072_v18, 16 }
  0x89   : > { %2862 = vmatprep.subr.bf16.mxu1 %v3105_v1 }
  0x8a   : > { %2827 = vmatpush3.bf16.msra.mxu0 %v3050_v26  ;;  %v1472_v26 = vsel %vm635_vm2, %v1467_v20, %v1471_v21 }
  0x8b   : > { %2828 = vmatprep.subr.bf16.mxu0 %v3105_v1 }
  0x8c   : > { %2863 = vmatpush3.bf16.msra.mxu1 %v3053_v30  ;;  %v1704_v30 = vsel %vm1678_vm6, %v1694_v9, %v1703_v23 }
  0x8d   : > { %2773 = vmatmul.mubr.bf16.gmra.mxu0 %v1064_v31  ;;  %2864 = vmatprep.subr.bf16.mxu1 %v3105_v1  ;;  %v1708_v31 = vrot.slane %v1706_v24, 1 }
  0x8e   : > { %2809 = vmatmul.mubr.bf16.gmra.mxu1 %v1257_v34  ;;  %2829 = vmatpush3.bf16.msra.mxu0 %v3052_v32  ;;  %v1711_v32 = vrot.slane %v1709_v25, 2  ;;  %v1475_v34 = vor.u32 %v1473_v28, %v1471_v21 }
  0x8f   : > { %2776 = vmatprep.mubr.msk.bf16.mxu0 %vm3106_vm0, %v3105_v1  ;;  %2812 = vmatprep.mubr.msk.bf16.mxu1 %vm3106_vm0, %v3105_v1 }
  0x90   : > { %2830 = vmatprep.subr.bf16.mxu0 %v3105_v1  ;;  %2865 = vmatpush3.bf16.msra.mxu1 %v3055_v37  ;;  %v3599_v37 = vld [vmem:[%s3198_s16 + $0x24] sm:$0x1f]   ;;  %v1480_v41 = vsel %vm635_vm2, %v1475_v34, %v1479_v35 }
  0x91   : > { %2866 = vmatprep.subr.bf16.mxu1 %v3105_v1  ;;  %v1485_v45 = vshll.u32 %v3599_v37, 16  ;;  %v1489_v57 = vshrl.u32 %v3599_v37, 16  ;;  %v1885_v2 = vrot.slane %v3599_v37, 1 }
  0x92   : > { %2831 = vmatpush3.bf16.msra.mxu0 %v3056_v39  ;;  %v1715_v39 = vshrl.u32 %v3076_v33, 16 }
  0x93   : > { %2832 = vmatprep.subr.bf16.mxu0 %v3105_v1  ;;  %v1886_v42 = vsel %vm300_vm1, %v1883_v0, %v1885_v2 }
  0x94   : > { %2867 = vmatpush3.bf16.msra.mxu1 %v3057_v43  ;;  %v3074_v43 = vld [vmem:[%s3739_s1 + $0x218] sm:$0xff]  }
  0x95   : > { %2777 = vmatmul.mubr.bf16.gmra.mxu0 %v1066_v44  ;;  %2868 = vmatprep.subr.bf16.mxu1 %v3105_v1  ;;  %v1481_v44 = vshrl.u32 %v3577_v22, 16 }
  0x96   : > { %2813 = vmatmul.mubr.bf16.gmra.mxu1 %v1266_v46  ;;  %2780 = vmatprep.mubr.msk.bf16.mxu0 %vm3106_vm0, %v3105_v1 }
  0x97   : > { %2816 = vmatprep.mubr.msk.bf16.mxu1 %vm3106_vm0, %v3105_v1  ;;  %2833 = vmatpush3.bf16.msra.mxu0 %v3058_v47  ;;  %v1717_v47 = vrot.slane %v1715_v39, 1  ;;  %v1483_v49 = vor.u32 %v1481_v44, %v1479_v35 }
  0x98   : > { %2869 = vmatpush3.bf16.msra.mxu1 %v3059_v50  ;;  %2834 = vmatprep.subr.bf16.mxu0 %v3105_v1  ;;  %v1487_v50 = vrot.slane %v1485_v45, 1 }
  0x99   : > { %2870 = vmatprep.subr.bf16.mxu1 %v3105_v1 }
  0x9a   : > { %v1488_v54 = vsel %vm635_vm2, %v1483_v49, %v1487_v50  ;;  %v1491_v58 = vor.u32 %v1489_v57, %v1487_v50 }
  0x9b   : > { %2835 = vmatpush3.bf16.msra.mxu0 %v3060_v53 }
  0x9c   : > { %2871 = vmatpush3.bf16.msra.mxu1 %v3061_v59  ;;  %2892 = vmatprep.subr.bf16.mxu0 %v3105_v1  ;;  %v3079_v59 = vld [vmem:[%s3739_s1 + $0x200] sm:$0xff]  }
  0x9d   : > { %2781 = vmatmul.mubr.bf16.gmra.mxu0 %v1065_v38  ;;  %2928 = vmatprep.subr.bf16.mxu1 %v3105_v1  ;;  %v1712_v38 = vor.u32 %v1711_v32, %v1708_v31 }
  0x9e   : > { %2817 = vmatmul.mubr.bf16.gmra.mxu1 %v1265_v40  ;;  %2836 = vmatprep.mubr.msk.bf16.mxu0 %vm3106_vm0, %v3105_v1  ;;  %v1718_v40 = vshll.u32 %v3076_v33, 16 }
  0x9f   : > { %2872 = vmatprep.mubr.msk.bf16.mxu1 %vm3106_vm0, %v3105_v1  ;;  %v1713_v46 = vsel %vm1678_vm6, %v1703_v23, %v1712_v38 }
  0xa0   : > { %v1720_v48 = vrot.slane %v1718_v40, 2 }
  0xa2   : > { %v1721_v53 = vor.u32 %v1720_v48, %v1717_v47 }
  0xa4   : > { %v1722_v55 = vsel %vm1678_vm6, %v1712_v38, %v1721_v53 }
  0xa5   : > { %2837 = vmatmul.mubr.bf16.vlgmr.msra.gmra.mxu0 %v1464_v11 }
  0xa6   : > { %2873 = vmatmul.mubr.bf16.vlgmr.msra.gmra.mxu1 %v1695_v15  ;;  %2893 = vmatpush3.bf16.msra.mxu0 %v3066_v12 }
  0xa7   : > { %2894 = vmatprep.subr.bf16.mxu0 %v3105_v1  ;;  %2840 = vmatprep.mubr.msk.bf16.mxu0 %vm3106_vm0, %v3105_v1 }
  0xa8   : > { %2876 = vmatprep.mubr.msk.bf16.mxu1 %vm3106_vm0, %v3105_v1  ;;  %2936 = vmatpush3.bf16.msra.mxu1 %v3066_v12 }
  0xa9   : > { %2929 = vmatprep.subr.bf16.mxu1 %v3105_v1 }
  0xaa   : > { %2895 = vmatpush3.bf16.msra.mxu0 %v3067_v19 }
  0xab   : > { %2896 = vmatprep.subr.bf16.mxu0 %v3105_v1 }
  0xac   : > { %2937 = vmatpush3.bf16.msra.mxu1 %v3067_v19 }
  0xad   : > { %2841 = vmatmul.mubr.bf16.gmra.mxu0 %v1472_v26  ;;  %2930 = vmatprep.subr.bf16.mxu1 %v3105_v1 }
  0xae   : > { %2877 = vmatmul.mubr.bf16.gmra.mxu1 %v1704_v30  ;;  %2897 = vmatpush3.bf16.msra.mxu0 %v3070_v27 }
  0xaf   : > { %2844 = vmatprep.mubr.msk.bf16.mxu0 %vm3106_vm0, %v3105_v1  ;;  %2880 = vmatprep.mubr.msk.bf16.mxu1 %vm3106_vm0, %v3105_v1 }
  0xb0   : > { %2898 = vmatprep.subr.bf16.mxu0 %v3105_v1  ;;  %2938 = vmatpush3.bf16.msra.mxu1 %v3070_v27 }
  0xb1   : > { %2931 = vmatprep.subr.bf16.mxu1 %v3105_v1 }
  0xb2   : > { %2899 = vmatpush3.bf16.msra.mxu0 %v3073_v36 }
  0xb3   : > { %2900 = vmatprep.subr.bf16.mxu0 %v3105_v1 }
  0xb4   : > { %2939 = vmatpush3.bf16.msra.mxu1 %v3073_v36 }
  0xb5   : > { %2845 = vmatmul.mubr.bf16.gmra.mxu0 %v1480_v41  ;;  %2932 = vmatprep.subr.bf16.mxu1 %v3105_v1 }
  0xb6   : > { %2881 = vmatmul.mubr.bf16.gmra.mxu1 %v1713_v46  ;;  %2901 = vmatpush3.bf16.msra.mxu0 %v3074_v43 }
  0xb7   : > { %2848 = vmatprep.mubr.msk.bf16.mxu0 %vm3106_vm0, %v3105_v1  ;;  %2884 = vmatprep.mubr.msk.bf16.mxu1 %vm3106_vm0, %v3105_v1 }
  0xb8   : > { %2940 = vmatpush3.bf16.msra.mxu1 %v3074_v43  ;;  %2902 = vmatprep.subr.bf16.mxu0 %v3105_v1 }
  0xb9   : > { %2933 = vmatprep.subr.bf16.mxu1 %v3105_v1 }
  0xba   : > { %2903 = vmatpush3.bf16.msra.mxu0 %v3077_v52 }
  0xbb   : > { %2904 = vmatprep.subr.bf16.mxu0 %v3105_v1 }
  0xbc   : > { %2941 = vmatpush3.bf16.msra.mxu1 %v3077_v52 }
  0xbd   : > { %2849 = vmatmul.mubr.bf16.gmra.mxu0 %v1488_v54  ;;  %2934 = vmatprep.subr.bf16.mxu1 %v3105_v1 }
  0xbe   : > { %2885 = vmatmul.mubr.bf16.gmra.mxu1 %v1722_v55  ;;  %2852 = vmatprep.mubr.msk.bf16.mxu0 %vm3106_vm0, %v3105_v1 }
  0xbf   : > { %2888 = vmatprep.mubr.msk.bf16.mxu1 %vm3106_vm0, %v3105_v1  ;;  %2905 = vmatpush3.bf16.msra.mxu0 %v3078_v56 }
  0xc0   : > { %2942 = vmatpush3.bf16.msra.mxu1 %v3078_v56  ;;  %2906 = vmatprep.subr.bf16.mxu0 %v3105_v1 }
  0xc1   : > { %2935 = vmatprep.subr.bf16.mxu1 %v3105_v1 }
  0xc3   : > { %2907 = vmatpush3.bf16.msra.mxu0 %v3079_v59 }
  0xc4   : > { %2943 = vmatpush3.bf16.msra.mxu1 %v3079_v59 }
  0xc5   : > { %2853 = vmatmul.mubr.bf16.gmra.mxu0 %v1491_v58 }
  0xc6   : > { %2889 = vmatmul.mubr.bf16.gmra.mxu1 %v1721_v53  ;;  %2908 = vmatprep.mubr.msk.bf16.mxu0 %vm3106_vm0, %v3105_v1 }
  0xc7   : > { %2920 = vmatprep.mubr.msk.bf16.mxu1 %vm3106_vm0, %v3105_v1 }
  0xcd   : > { %2909 = vmatmul.mubr.bf16.vlgmr.msra.gmra.mxu0 %v1880_v3 }
  0xce   : > { %2921 = vmatmul.mubr.bf16.vlgmr.msra.gmra.mxu1 %v1886_v42  ;;  %2912 = vmatprep.mubr.msk.bf16.mxu0 %vm3106_vm0, %v3105_v1 }
  0xcf   : > { %2924 = vmatprep.mubr.msk.bf16.mxu1 %vm3106_vm0, %v3105_v1 }
  0xd5   : > { %2913 = vmatmul.mubr.bf16.gmra.mxu0 %v1882_v51 }
  0xd6   : > { %2925 = vmatmul.mubr.bf16.gmra.mxu1 %v1885_v2  ;;  %2916 = vmatprep.mubr.msk.bf16.mxu0 %vm3106_vm0, %v3105_v1 }
  0xdd   : > { %2917 = vmatmul.mubr.bf16.gmra.mxu0 %v1884_v5 }
  0xed   : > { %v397_v8 = vpop.f32.mrf.mxu0 }
  0xee   : > { %v545_v9 = vpop.f32.mrf.mxu1 }
  0xef   : > { %v546_v10 = vadd.f32 %v545_v9, %v397_v8  ;;  %v2622_v6 = vpop.f32.mrf.mxu0 }
  0xf0   : > { %v2658_v11 = vpop.f32.mrf.mxu1 }
  0xf1   : > { %v400_v12 = vpop.f32.mrf.mxu0 }
  0xf2   : > { %v548_v7 = vpop.f32.mrf.mxu1 }
  0xf3   : > { %v549_v13 = vadd.f32 %v548_v7, %v400_v12  ;;  %v2623_v14 = vpop.f32.mrf.mxu0 }
  0xf4   : > { %v2659_v15 = vpop.f32.mrf.mxu1 }
  0xf5   : > { %v405_v16 = vpop.f32.mrf.mxu0 }
  0xf6   : > { %v553_v17 = vpop.f32.mrf.mxu1 }
  0xf7   : > { %v554_v18 = vadd.f32 %v553_v17, %v405_v16  ;;  %v2626_v19 = vpop.f32.mrf.mxu0 }
  0xf8   : > { %v2662_v20 = vpop.f32.mrf.mxu1 }
  0xf9   : > { %v408_v21 = vpop.f32.mrf.mxu0 }
  0xfa   : > { %v556_v1 = vpop.f32.mrf.mxu1 }
  0xfb   : > { %v557_v22 = vadd.f32 %v556_v1, %v408_v21  ;;  %v2627_v23 = vpop.f32.mrf.mxu0 }
  0xfc   : > { %v2663_v24 = vpop.f32.mrf.mxu1 }
  0xfd   : > { %v413_v25 = vpop.f32.mrf.mxu0 }
  0xfe   : > { %v561_v26 = vpop.f32.mrf.mxu1 }
  0xff   : > { %v562_v27 = vadd.f32 %v561_v26, %v413_v25  ;;  %v2630_v28 = vpop.f32.mrf.mxu0 }
 0x100   : > { %v2666_v29 = vpop.f32.mrf.mxu1 }
 0x101   : > { %v416_v30 = vpop.f32.mrf.mxu0 }
 0x102   : > { %v564_v31 = vpop.f32.mrf.mxu1 }
 0x103   : > { %v565_v32 = vadd.f32 %v564_v31, %v416_v30  ;;  %v2631_v33 = vpop.f32.mrf.mxu0 }
 0x104   : > { %v2667_v34 = vpop.f32.mrf.mxu1 }
 0x105   : > { %v421_v35 = vpop.f32.mrf.mxu0 }
 0x106   : > { %v569_v36 = vpop.f32.mrf.mxu1 }
 0x107   : > { %v570_v37 = vadd.f32 %v569_v36, %v421_v35  ;;  %v2634_v38 = vpop.f32.mrf.mxu0 }
 0x108   : > { %v2670_v39 = vpop.f32.mrf.mxu1 }
 0x109   : > { %v424_v40 = vpop.f32.mrf.mxu0 }
 0x10a   : > { %v572_v41 = vpop.f32.mrf.mxu1 }
 0x10b   : > { %v573_v43 = vadd.f32 %v572_v41, %v424_v40  ;;  %v2635_v44 = vpop.f32.mrf.mxu0 }
 0x10c   : > { %v2671_v45 = vpop.f32.mrf.mxu1 }
 0x10d   : > { %v429_v46 = vpop.f32.mrf.mxu0 }
 0x10e   : > { %v577_v47 = vpop.f32.mrf.mxu1 }
 0x10f   : > { %v578_v48 = vadd.f32 %v577_v47, %v429_v46  ;;  %v2638_v49 = vpop.f32.mrf.mxu0 }
 0x110   : > { %v2674_v50 = vpop.f32.mrf.mxu1 }
 0x111   : > { %v432_v52 = vpop.f32.mrf.mxu0 }
 0x112   : > { %v580_v53 = vpop.f32.mrf.mxu1 }
 0x113   : > { %v2639_v54 = vpop.f32.mrf.mxu0 }
 0x114   : > { %v2675_v55 = vpop.f32.mrf.mxu1 }
 0x115   : > { %v762_v56 = vpop.f32.mrf.mxu0 }
 0x116   : > { %v800_v57 = vadd.f32 %v762_v56, %v546_v10  ;;  %v958_v59 = vpop.f32.mrf.mxu1 }
 0x117   : > { %v2694_v60 = vpop.f32.mrf.mxu0 }
 0x118   : > { %v996_v58 = vadd.f32 %v958_v59, %v800_v57  ;;  %v2730_v61 = vpop.f32.mrf.mxu1 }
 0x119   : > { %v765_v62 = vpop.f32.mrf.mxu0 }
 0x11a   : > { %v801_v63 = vadd.f32 %v765_v62, %v549_v13  ;;  %v961_v0 = vpop.f32.mrf.mxu1 }
 0x11b   : > { %v2695_v2 = vpop.f32.mrf.mxu0 }
 0x11c   : > { %v997_v3 = vadd.f32 %v961_v0, %v801_v63  ;;  %v2731_v42 = vpop.f32.mrf.mxu1 }
 0x11d   : > { %v770_v4 = vpop.f32.mrf.mxu0 }
 0x11e   : > { %v802_v51 = vadd.f32 %v770_v4, %v554_v18  ;;  %v966_v5 = vpop.f32.mrf.mxu1 }
 0x11f   : > { %v2698_v8 = vpop.f32.mrf.mxu0 }
 0x120   : > { %v998_v9 = vadd.f32 %v966_v5, %v802_v51  ;;  %v2734_v6 = vpop.f32.mrf.mxu1 }
 0x121   : > { %v773_v11 = vpop.f32.mrf.mxu0 }
 0x122   : > { %v803_v12 = vadd.f32 %v773_v11, %v557_v22  ;;  %v969_v7 = vpop.f32.mrf.mxu1 }
 0x123   : > { %v2699_v10 = vpop.f32.mrf.mxu0 }
 0x124   : > { %v999_v14 = vadd.f32 %v969_v7, %v803_v12  ;;  %v2735_v15 = vpop.f32.mrf.mxu1 }
 0x125   : > { %v778_v16 = vpop.f32.mrf.mxu0 }
 0x126   : > { %v804_v17 = vadd.f32 %v778_v16, %v562_v27  ;;  %v974_v19 = vpop.f32.mrf.mxu1 }
 0x127   : > { %v2702_v13 = vpop.f32.mrf.mxu0 }
 0x128   : > { %v1000_v20 = vadd.f32 %v974_v19, %v804_v17  ;;  %v2738_v21 = vpop.f32.mrf.mxu1 }
 0x129   : > { %v781_v1 = vpop.f32.mrf.mxu0 }
 0x12a   : > { %v805_v23 = vadd.f32 %v781_v1, %v565_v32  ;;  %v977_v24 = vpop.f32.mrf.mxu1 }
 0x12b   : > { %v2703_v18 = vpop.f32.mrf.mxu0 }
 0x12c   : > { %v1001_v25 = vadd.f32 %v977_v24, %v805_v23  ;;  %v2739_v26 = vpop.f32.mrf.mxu1 }
 0x12d   : > { %v786_v28 = vpop.f32.mrf.mxu0 }
 0x12e   : > { %v806_v29 = vadd.f32 %v786_v28, %v570_v37  ;;  %v982_v30 = vpop.f32.mrf.mxu1 }
 0x12f   : > { %v2706_v22 = vpop.f32.mrf.mxu0 }
 0x130   : > { %v3662_v31 = vadd.f32 %v982_v30, %v806_v29  ;;  %v2742_v33 = vpop.f32.mrf.mxu1 }
 0x131   : > { %v789_v34 = vpop.f32.mrf.mxu0 }
 0x132   : > { %v807_v35 = vadd.f32 %v789_v34, %v573_v43  ;;  %v985_v27 = vpop.f32.mrf.mxu1 }
 0x133   : > { %v2707_v36 = vpop.f32.mrf.mxu0 }
 0x134   : > { %v3664_v38 = vadd.f32 %v985_v27, %v807_v35  ;;  %v2743_v39 = vpop.f32.mrf.mxu1 }
 0x135   : > { %v794_v40 = vpop.f32.mrf.mxu0 }
 0x136   : > { %v808_v32 = vadd.f32 %v794_v40, %v578_v48  ;;  %v990_v41 = vpop.f32.mrf.mxu1 }
 0x137   : > { %v2710_v44 = vpop.f32.mrf.mxu0 }
 0x138   : > { %v3666_v45 = vadd.f32 %v990_v41, %v808_v32  ;;  %v2746_v46 = vpop.f32.mrf.mxu1 }
 0x139   : > { %v797_v37 = vpop.f32.mrf.mxu0 }
 0x13a   : > { %v993_v47 = vpop.f32.mrf.mxu1 }
 0x13b   : > { %v2711_v49 = vpop.f32.mrf.mxu0 }
 0x13c   : > { %v2747_v50 = vpop.f32.mrf.mxu1 }
 0x13d   : > { %v1154_v52 = vpop.f32.mrf.mxu0 }
 0x13e   : > { %v1192_v53 = vadd.f32 %v1154_v52, %v996_v58  ;;  %v1354_v54 = vpop.f32.mrf.mxu1 }
 0x13f   : > { %v2766_v43 = vpop.f32.mrf.mxu0 }
 0x140   : > { %v3668_v55 = vadd.f32 %v1354_v54, %v1192_v53  ;;  %v2802_v56 = vpop.f32.mrf.mxu1 }
 0x141   : > { %v1157_v57 = vpop.f32.mrf.mxu0 }
 0x142   : > { %v1193_v59 = vadd.f32 %v1157_v57, %v997_v3  ;;  %v1357_v60 = vpop.f32.mrf.mxu1 }
 0x143   : > { %v2767_v48 = vpop.f32.mrf.mxu0 }
 0x144   : > { %v3670_v61 = vadd.f32 %v1357_v60, %v1193_v59  ;;  %v2803_v62 = vpop.f32.mrf.mxu1 }
 0x145   : > { %v1162_v63 = vpop.f32.mrf.mxu0 }
 0x146   : > { %v1194_v0 = vadd.f32 %v1162_v63, %v998_v9  ;;  %v1362_v2 = vpop.f32.mrf.mxu1 }
 0x147   : > { %v2770_v42 = vpop.f32.mrf.mxu0 }
 0x148   : > { %v3672_v4 = vadd.f32 %v1362_v2, %v1194_v0  ;;  %v2806_v51 = vpop.f32.mrf.mxu1 }
 0x149   : > { %v1165_v58 = vpop.f32.mrf.mxu0 }
 0x14a   : > { %v1195_v5 = vadd.f32 %v1165_v58, %v999_v14  ;;  %v1365_v8 = vpop.f32.mrf.mxu1 }
 0x14b   : > { %v2771_v6 = vpop.f32.mrf.mxu0 }
 0x14c   : > { %v3674_v11 = vadd.f32 %v1365_v8, %v1195_v5  ;;  %v2807_v12 = vpop.f32.mrf.mxu1 }
 0x14d   : > { %v1170_v3 = vpop.f32.mrf.mxu0 }
 0x14e   : > { %v1196_v7 = vadd.f32 %v1170_v3, %v1000_v20  ;;  %v1370_v10 = vpop.f32.mrf.mxu1 }
 0x14f   : > { %v2774_v15 = vpop.f32.mrf.mxu0 }
 0x150   : > { %v3676_v16 = vadd.f32 %v1370_v10, %v1196_v7  ;;  %v2810_v17 = vpop.f32.mrf.mxu1 }
 0x151   : > { %v1173_v9 = vpop.f32.mrf.mxu0 }
 0x152   : > { %v1197_v19 = vadd.f32 %v1173_v9, %v1001_v25  ;;  %v1373_v13 = vpop.f32.mrf.mxu1 }
 0x153   : > { %v2775_v21 = vpop.f32.mrf.mxu0 }
 0x154   : > { %v3678_v1 = vadd.f32 %v1373_v13, %v1197_v19  ;;  %v2811_v23 = vpop.f32.mrf.mxu1 }
 0x155   : > { %v1178_v14 = vpop.f32.mrf.mxu0 }
 0x156   : > { %v1378_v24 = vpop.f32.mrf.mxu1  ;;  %v1198_v7 = vadd.f32 %v1178_v14, %v3662_v31 }
 0x157   : > { %v2778_v18 = vpop.f32.mrf.mxu0 }
 0x158   : > { %v2814_v26 = vpop.f32.mrf.mxu1  ;;  %v1398_v19 = vadd.f32 %v1378_v24, %v1198_v7 }
 0x159   : > { %v1181_v28 = vpop.f32.mrf.mxu0 }
 0x15a   : > { %v1381_v29 = vpop.f32.mrf.mxu1  ;;  %v1199_v13 = vadd.f32 %v1181_v28, %v3664_v38 }
 0x15b   : > { %v2779_v30 = vpop.f32.mrf.mxu0 }
 0x15c   : > { %v2815_v20 = vpop.f32.mrf.mxu1 }
 0x15d   : > { %v1186_v22 = vpop.f32.mrf.mxu0 }
 0x15e   : > { %v1386_v33 = vpop.f32.mrf.mxu1 }
 0x15f   : > { %v2782_v34 = vpop.f32.mrf.mxu0 }
 0x160   : > { %v2818_v35 = vpop.f32.mrf.mxu1  ;;  %v1399_v34 = vadd.f32 %v1381_v29, %v1199_v13 }
 0x161   : > { %v1189_v27 = vpop.f32.mrf.mxu0  ;;  %v1200_v35 = vadd.f32 %v1186_v22, %v3666_v45 }
 0x162   : > { %v1389_v36 = vpop.f32.mrf.mxu1 }
 0x163   : > { %v2783_v25 = vpop.f32.mrf.mxu0  ;;  %v1400_v28 = vadd.f32 %v1386_v33, %v1200_v35 }
 0x164   : > { %v2819_v39 = vpop.f32.mrf.mxu1 }
 0x165   : > { %v1579_v40 = vpop.f32.mrf.mxu0 }
 0x166   : > { %v1810_v32 = vpop.f32.mrf.mxu1  ;;  %v1617_v23 = vadd.f32 %v1579_v40, %v3668_v55  ;;  %v3698_v55 = vld [vmem:[%s3740_s2] ss:$0 sm:$0xff] }
 0x167   : > { %v2838_v41 = vpop.f32.mrf.mxu0 }
 0x168   : > { %v2874_v44 = vpop.f32.mrf.mxu1  ;;  %v1848_v36 = vadd.f32 %v1810_v32, %v1617_v23 }
 0x169   : > { %v1582_v46 = vpop.f32.mrf.mxu0 }
 0x16a   : > { %v1813_v37 = vpop.f32.mrf.mxu1  ;;  %v1618_v31 = vadd.f32 %v1582_v46, %v3670_v61 }
 0x16b   : > { %v2839_v47 = vpop.f32.mrf.mxu0 }
 0x16c   : > { %v2875_v49 = vpop.f32.mrf.mxu1  ;;  %v1849_v45 = vadd.f32 %v1813_v37, %v1618_v31 }
 0x16d   : > { %v1587_v50 = vpop.f32.mrf.mxu0 }
 0x16e   : > { %v1818_v52 = vpop.f32.mrf.mxu1  ;;  %v1619_v22 = vadd.f32 %v1587_v50, %v3672_v4 }
 0x16f   : > { %v2842_v53 = vpop.f32.mrf.mxu0 }
 0x170   : > { %v2878_v54 = vpop.f32.mrf.mxu1 }
 0x171   : > { %v1590_v43 = vpop.f32.mrf.mxu0 }
 0x172   : > { %v3680_v56 = vpop.f32.mrf.mxu1 }
 0x173   : > { %v2843_v57 = vpop.f32.mrf.mxu0 }
 0x174   : > { %v2879_v59 = vpop.f32.mrf.mxu1 }
 0x175   : > { %v3682_v60 = vpop.f32.mrf.mxu0  ;;  %v1850_v59 = vadd.f32 %v1818_v52, %v1619_v22 }
 0x176   : > { %v3684_v48 = vpop.f32.mrf.mxu1 }
 0x177   : > { %v2846_v62 = vpop.f32.mrf.mxu0 }
 0x178   : > { %v2882_v63 = vpop.f32.mrf.mxu1  ;;  %v1620_v62 = vadd.f32 %v1590_v43, %v3674_v11 }
 0x179   : > { %v3686_v0 = vpop.f32.mrf.mxu0 }
 0x17a   : > { %v3688_v2 = vpop.f32.mrf.mxu1 }
 0x17b   : > { %v2847_v42 = vpop.f32.mrf.mxu0 }
 0x17c   : > { %v2883_v51 = vpop.f32.mrf.mxu1 }
 0x17d   : > { %v1603_v58 = vpop.f32.mrf.mxu0 }
 0x17e   : > { %v1834_v5 = vpop.f32.mrf.mxu1  ;;  %v1623_v26 = vadd.f32 %v1603_v58, %v1398_v19 }
 0x17f   : > { %v2850_v8 = vpop.f32.mrf.mxu0 }
 0x180   : > { %v2886_v6 = vpop.f32.mrf.mxu1  ;;  %v1854_v25 = vadd.f32 %v1834_v5, %v1623_v26 }
 0x181   : > { %v1606_v12 = vpop.f32.mrf.mxu0 }
 0x182   : > { %v1837_v3 = vpop.f32.mrf.mxu1  ;;  %v1624_v39 = vadd.f32 %v1606_v12, %v1399_v34  ;;  %v1851_v12 = vadd.f32 %v3680_v56, %v1620_v62 }
 0x183   : > { %v2851_v10 = vpop.f32.mrf.mxu0 }
 0x184   : > { %v2887_v15 = vpop.f32.mrf.mxu1  ;;  %v1855_v61 = vadd.f32 %v1837_v3, %v1624_v39  ;;  %v1621_v3 = vadd.f32 %v3682_v60, %v3676_v16  ;;  %v1622_v16 = vadd.f32 %v3686_v0, %v3678_v1 }
 0x185   : > { %v1611_v17 = vpop.f32.mrf.mxu0 }
 0x186   : > { %v1842_v9 = vpop.f32.mrf.mxu1  ;;  %v1625_v44 = vadd.f32 %v1611_v17, %v1400_v28  ;;  %v1852_v56 = vadd.f32 %v3684_v48, %v1621_v3  ;;  %v1853_v31 = vadd.f32 %v3688_v2, %v1622_v16 }
 0x187   : > { %v2854_v21 = vpop.f32.mrf.mxu0 }
 0x188   : > { %v2890_v18 = vpop.f32.mrf.mxu1  ;;  %v1856_v4 = vadd.f32 %v1842_v9, %v1625_v44 }
 0x189   : > { %v1614_v30 = vpop.f32.mrf.mxu0 }
 0x18a   : > { %v1845_v20 = vpop.f32.mrf.mxu1 }
 0x18b   : > { %v2855_v27 = vpop.f32.mrf.mxu0 }
 0x18c   : > { %v2891_v14 = vpop.f32.mrf.mxu1 }
 0x18d   : > { %v1974_v24 = vpop.f32.mrf.mxu0 }
 0x18e   : > { %v2012_v41 = vadd.f32 %v1974_v24, %v1848_v36  ;;  %v1998_v38 = vpop.f32.mrf.mxu1 }
 0x18f   : > { %v2018_v29 = vadd.f32 %v1998_v38, %v1854_v25  ;;  %v2910_v40 = vpop.f32.mrf.mxu0 }
 0x190   : > { %v2922_v32 = vpop.f32.mrf.mxu1  ;;  %v2028_v47 = vadd.f32 %v3698_v55, %v2012_v41 }
 0x191   : > { %v1977_v46 = vpop.f32.mrf.mxu0  ;;  %v2034_v33 = vadd.f32 %v3698_v55, %v2018_v29 }
 0x192   : > { %v2013_v49 = vadd.f32 %v1977_v46, %v1849_v45  ;;  %v2001_v53 = vpop.f32.mrf.mxu1  ;;  %v2037_v51 = vmax.f32 %v2028_v47, 0.0 }
 0x193   : > { %v2019_v54 = vadd.f32 %v2001_v53, %v1855_v61  ;;  %v2911_v57 = vpop.f32.mrf.mxu0  ;;  %v2043_v6 = vmax.f32 %v2034_v33, 0.0 }
 0x194   : > { %v2029_v37 = vadd.f32 %v3698_v55, %v2013_v49  ;;  %v2923_v63 = vpop.f32.mrf.mxu1 }
 0x195   : > { %v2035_v50 = vadd.f32 %v3698_v55, %v2019_v54  ;;  %v1982_v42 = vpop.f32.mrf.mxu0 }
 0x196   : > { %v2038_v58 = vmax.f32 %v2029_v37, 0.0  ;;  %v2014_v5 = vadd.f32 %v1982_v42, %v1850_v59  ;;  %v2006_v8 = vpop.f32.mrf.mxu1 }
 0x197   : > { %v2044_v11 = vmax.f32 %v2035_v50, 0.0  ;;  %v2020_v52 = vadd.f32 %v2006_v8, %v1856_v4  ;;  %v2914_v43 = vpop.f32.mrf.mxu0 }
 0x198   : > { %v2467_v7 = vpack.c.bf16 %v2038_v58, %v2037_v51  ;;  %v2926_v10 = vpop.f32.mrf.mxu1  ;;  %v2030_v19 = vadd.f32 %v3698_v55, %v2014_v5 }
 0x199   : > { %v2482_v15 = vpack.c.bf16 %v2044_v11, %v2043_v6  ;;  %v2036_v17 = vadd.f32 %v3698_v55, %v2020_v52  ;;  %v1985_v9 = vpop.f32.mrf.mxu0 }
 0x19a   : > { %2468 = vst [vmem:[%s3710_s12] sm:$0xff] %v2467_v7   ;;  %v2015_v13 = vadd.f32 %v1985_v9, %v1851_v12  ;;  %v2009_v21 = vpop.f32.mrf.mxu1  ;;  %v2039_v34 = vmax.f32 %v2030_v19, 0.0 }
 0x19b   : > { %2486 = vst [vmem:[%s3710_s12 + $0x18] sm:$0xff] %v2482_v15   ;;  %v2045_v23 = vmax.f32 %v2036_v17, 0.0  ;;  %v2915_v18 = vpop.f32.mrf.mxu0 }
 0x19c   : > { %v2031_v60 = vadd.f32 %v3698_v55, %v2015_v13  ;;  %v2927_v26 = vpop.f32.mrf.mxu1 }
 0x19d   : > { %v2463_v30 = vpack.c.bf16 %v2045_v23, %v2045_v23  ;;  %v1990_v20 = vpop.f32.mrf.mxu0 }
 0x19e   : > { %v2040_v35 = vmax.f32 %v2031_v60, 0.0  ;;  %v2016_v27 = vadd.f32 %v1990_v20, %v1852_v56 }
 0x19f   : > { %2091 = vst [vmem:[%s3710_s12 + $0x20] sm:$0xf] %v2463_v30  ;;  %v2918_v36 = vpop.f32.mrf.mxu0 }
 0x1a0   : > { %v2472_v14 = vpack.c.bf16 %v2040_v35, %v2039_v34  ;;  %v2032_v48 = vadd.f32 %v3698_v55, %v2016_v27 }
 0x1a1   : > { %v1993_v25 = vpop.f32.mrf.mxu0 }
 0x1a2   : > { %2484 = vst [vmem:[%s3710_s12 + $0x8] sm:$0xff] %v2472_v14   ;;  %v2017_v39 = vadd.f32 %v1993_v25, %v1853_v31  ;;  %v2041_v24 = vmax.f32 %v2032_v48, 0.0 }
 0x1a3   : > { %v2919_v1 = vpop.f32.mrf.mxu0 }
 0x1a4   : > { %v2033_v0 = vadd.f32 %v3698_v55, %v2017_v39 }
 0x1a6   : > { %v2042_v41 = vmax.f32 %v2033_v0, 0.0 }
 0x1a8   : > { %v2477_v38 = vpack.c.bf16 %v2042_v41, %v2041_v24 }
 0x1aa   : > { %2485 = vst [vmem:[%s3710_s12 + $0x10] sm:$0xff] %v2477_v38  }
 0x1ab PF: > { %s13_s14 = sadd.s32 1, %s3103_s14   ;;  %s3742_s12 = smov %s3099_s13 }
 0x1ac   : > { %p10_p5 = scmp.ge.s32.totalorder %s13_s14, 4   ;;  %s3743_s13 = smov %s3745_s15 }
 0x1ae   :  { %12 = sbr.rel (!%p10_p5) target bundleno = 2 (0x2), region = 76 }

// kernel: resnet_bottleneck_forward.6
= control target key start
LH: loop header
LB: loop body
LE: loop exit
PB: predicated region body
PF: predicated region fallthrough
CT: control target
= control target key end

     0   :  { %s705_s1 = inlined_call_operand.vmem [shape: bf16[128,128], index: 1, kind: input, shape index: {}]   ;;  %s706_s0 = inlined_call_operand.vmem [shape: bf16[128,128], index: 0, kind: input, shape index: {}]   ;;  %s707_s2 = inlined_call_operand.vmem [shape: f32[1,128], index: 2, kind: input, shape index: {}]   ;;  %s708_s3 = inlined_call_operand.vmem [shape: bf16[128,128], index: 3, kind: output, shape index: {}]  }
   0x1   :  { %v594_v0 = vld [vmem:[%s705_s1 + $0x38] sm:$0xff]   ;;  %v595_v1 = vld [vmem:[%s705_s1 + $0x30] sm:$0xff]   ;;  %v596_v2 = vld [vmem:[%s705_s1 + $0x28] sm:$0xff]  }
   0x2   :  { %546 = vmatprep.subr.bf16.mxu0 %v594_v0  ;;  %578 = vmatprep.subr.bf16.mxu1 %v594_v0  ;;  %v597_v3 = vld [vmem:[%s705_s1 + $0x20] sm:$0xff]   ;;  %v598_v6 = vld [vmem:[%s705_s1 + $0x18] sm:$0xff]   ;;  %v599_v7 = vld [vmem:[%s705_s1 + $0x10] sm:$0xff]  }
   0x3   :  { %547 = vmatpush3.bf16.msra.mxu0 %v594_v0  ;;  %586 = vmatpush3.bf16.msra.mxu1 %v594_v0  ;;  %v602_v4 = vld [vmem:[%s706_s0] sm:$0xff]   ;;  %v600_v8 = vld [vmem:[%s705_s1 + $0x8] sm:$0xff]   ;;  %v606_v12 = vld [vmem:[%s706_s0 + $0x10] sm:$0xff]  }
   0x4   :  { %548 = vmatprep.subr.bf16.mxu0 %v595_v1  ;;  %579 = vmatprep.subr.bf16.mxu1 %v595_v1  ;;  %v603_v5 = vld [vmem:[%s706_s0 + $0x20] sm:$0xff]   ;;  %v604_v10 = vld [vmem:[%s706_s0 + $0x8] sm:$0xff]   ;;  %v607_v13 = vld [vmem:[%s706_s0 + $0x30] sm:$0xff]  }
   0x5   :  { %562 = vmatprep.mubr.bf16.mxu0 %v602_v4  ;;  %570 = vmatprep.mubr.bf16.mxu1 %v603_v5  ;;  %v601_v9 = vld [vmem:[%s705_s1] sm:$0xff]   ;;  %v605_v11 = vld [vmem:[%s706_s0 + $0x28] sm:$0xff]   ;;  %v608_v14 = vld [vmem:[%s706_s0 + $0x18] sm:$0xff]  }
   0x6   :  { %v609_v15 = vld [vmem:[%s706_s0 + $0x38] sm:$0xff]   ;;  %v450_v18 = vld [vmem:[%s707_s2] ss:$0 sm:$0xff] }
   0x7   :  { %549 = vmatpush3.bf16.msra.mxu0 %v595_v1  ;;  %587 = vmatpush3.bf16.msra.mxu1 %v595_v1 }
   0x8   :  { %550 = vmatprep.subr.bf16.mxu0 %v596_v2  ;;  %580 = vmatprep.subr.bf16.mxu1 %v596_v2 }
   0xb   :  { %551 = vmatpush3.bf16.msra.mxu0 %v596_v2  ;;  %588 = vmatpush3.bf16.msra.mxu1 %v596_v2 }
   0xc   :  { %552 = vmatprep.subr.bf16.mxu0 %v597_v3  ;;  %581 = vmatprep.subr.bf16.mxu1 %v597_v3 }
   0xf   :  { %553 = vmatpush3.bf16.msra.mxu0 %v597_v3  ;;  %589 = vmatpush3.bf16.msra.mxu1 %v597_v3 }
  0x10   :  { %554 = vmatprep.subr.bf16.mxu0 %v598_v6  ;;  %582 = vmatprep.subr.bf16.mxu1 %v598_v6 }
  0x13   :  { %555 = vmatpush3.bf16.msra.mxu0 %v598_v6  ;;  %590 = vmatpush3.bf16.msra.mxu1 %v598_v6 }
  0x14   :  { %556 = vmatprep.subr.bf16.mxu0 %v599_v7  ;;  %583 = vmatprep.subr.bf16.mxu1 %v599_v7 }
  0x17   :  { %557 = vmatpush3.bf16.msra.mxu0 %v599_v7  ;;  %591 = vmatpush3.bf16.msra.mxu1 %v599_v7 }
  0x18   :  { %558 = vmatprep.subr.bf16.mxu0 %v600_v8  ;;  %584 = vmatprep.subr.bf16.mxu1 %v600_v8 }
  0x1b   :  { %559 = vmatpush3.bf16.msra.mxu0 %v600_v8  ;;  %592 = vmatpush3.bf16.msra.mxu1 %v600_v8 }
  0x1c   :  { %560 = vmatprep.subr.bf16.mxu0 %v601_v9  ;;  %585 = vmatprep.subr.bf16.mxu1 %v601_v9 }
  0x1f   :  { %561 = vmatpush3.bf16.msra.mxu0 %v601_v9  ;;  %593 = vmatpush3.bf16.msra.mxu1 %v601_v9 }
  0x22   :  { %563 = vmatmul.mubr.bf16.vlgmr.msra.gmra.mxu0 %v604_v10  ;;  %571 = vmatmul.mubr.bf16.vlgmr.msra.gmra.mxu1 %v605_v11 }
  0x23   :  { %566 = vmatprep.mubr.bf16.mxu0 %v606_v12  ;;  %574 = vmatprep.mubr.bf16.mxu1 %v607_v13 }
  0x2a   :  { %567 = vmatmul.mubr.bf16.gmra.mxu0 %v608_v14  ;;  %575 = vmatmul.mubr.bf16.gmra.mxu1 %v609_v15 }
  0xe2   :  { %v564_v16 = vpop.f32.mrf.mxu0  ;;  %v572_v17 = vpop.f32.mrf.mxu1 }
  0xe3   :  { %v336_v23 = vadd.f32 %v564_v16, %v450_v18  ;;  %v344_v24 = vadd.f32 %v572_v17, %v450_v18 }
  0xe4   :  { %v213_v19 = vpop.f32.mrf.mxu0  ;;  %v245_v20 = vpop.f32.mrf.mxu1 }
  0xe5   :  { %v334_v27 = vadd.f32 %v450_v18, %v213_v19  ;;  %v342_v28 = vadd.f32 %v450_v18, %v245_v20 }
  0xe6   :  { %v565_v21 = vpop.f32.mrf.mxu0  ;;  %v573_v22 = vpop.f32.mrf.mxu1 }
  0xe7   :  { %v337_v25 = vadd.f32 %v565_v21, %v450_v18  ;;  %v345_v26 = vadd.f32 %v573_v22, %v450_v18 }
  0xe8   :  { %v216_v29 = vpop.f32.mrf.mxu0  ;;  %v248_v30 = vpop.f32.mrf.mxu1 }
  0xe9   :  { %v491_v31 = vpack.c.bf16 %v337_v25, %v336_v23  ;;  %v511_v32 = vpack.c.bf16 %v345_v26, %v344_v24  ;;  %v335_v33 = vadd.f32 %v450_v18, %v216_v29  ;;  %v343_v34 = vadd.f32 %v450_v18, %v248_v30 }
  0xea   :  { %v568_v35 = vpop.f32.mrf.mxu0  ;;  %v576_v36 = vpop.f32.mrf.mxu1 }
  0xeb   :  { %523 = vst [vmem:[%s708_s3 + $0x8] sm:$0xff] %v491_v31   ;;  %527 = vst [vmem:[%s708_s3 + $0x28] sm:$0xff] %v511_v32   ;;  %v486_v37 = vpack.c.bf16 %v335_v33, %v334_v27  ;;  %v506_v38 = vpack.c.bf16 %v343_v34, %v342_v28  ;;  %v340_v43 = vadd.f32 %v568_v35, %v450_v18 }
  0xec   :  { %v229_v39 = vpop.f32.mrf.mxu0  ;;  %v261_v40 = vpop.f32.mrf.mxu1  ;;  %v348_v44 = vadd.f32 %v576_v36, %v450_v18 }
  0xed   :  { %487 = vst [vmem:[%s708_s3] sm:$0xff] %v486_v37   ;;  %526 = vst [vmem:[%s708_s3 + $0x20] sm:$0xff] %v506_v38   ;;  %v338_v47 = vadd.f32 %v450_v18, %v229_v39  ;;  %v346_v48 = vadd.f32 %v450_v18, %v261_v40 }
  0xee   :  { %v569_v41 = vpop.f32.mrf.mxu0  ;;  %v577_v42 = vpop.f32.mrf.mxu1 }
  0xef   :  { %v341_v45 = vadd.f32 %v569_v41, %v450_v18  ;;  %v349_v46 = vadd.f32 %v577_v42, %v450_v18 }
  0xf0   :  { %v232_v49 = vpop.f32.mrf.mxu0  ;;  %v264_v50 = vpop.f32.mrf.mxu1 }
  0xf1   :  { %v501_v51 = vpack.c.bf16 %v341_v45, %v340_v43  ;;  %v521_v52 = vpack.c.bf16 %v349_v46, %v348_v44  ;;  %v339_v53 = vadd.f32 %v450_v18, %v232_v49  ;;  %v347_v54 = vadd.f32 %v450_v18, %v264_v50 }
  0xf3   :  { %525 = vst [vmem:[%s708_s3 + $0x18] sm:$0xff] %v501_v51   ;;  %529 = vst [vmem:[%s708_s3 + $0x38] sm:$0xff] %v521_v52   ;;  %v496_v55 = vpack.c.bf16 %v339_v53, %v338_v47  ;;  %v516_v56 = vpack.c.bf16 %v347_v54, %v346_v48 }
  0xf5   :  { %524 = vst [vmem:[%s708_s3 + $0x10] sm:$0xff] %v496_v55   ;;  %528 = vst [vmem:[%s708_s3 + $0x30] sm:$0xff] %v516_v56  }

// kernel: resnet_bottleneck_forward.7
= control target key start
LH: loop header
LB: loop body
LE: loop exit
PB: predicated region body
PF: predicated region fallthrough
CT: control target
= control target key end

     0   :  { %s755_s1 = inlined_call_operand.vmem [shape: bf16[128,128], index: 1, kind: input, shape index: {}]   ;;  %s756_s0 = inlined_call_operand.vmem [shape: bf16[128,128], index: 0, kind: input, shape index: {}]   ;;  %s757_s3 = inlined_call_operand.vmem [shape: bf16[128,128], index: 3, kind: input, shape index: {}]   ;;  %s758_s2 = inlined_call_operand.vmem [shape: f32[1,128], index: 2, kind: input, shape index: {}]   ;;  %s759_s4 = inlined_call_operand.vmem [shape: f32[128,128], index: 4, kind: output, shape index: {}]  }
   0x1   :  { %v557_v0 = vld [vmem:[%s755_s1 + $0x38] sm:$0xff]   ;;  %v558_v1 = vld [vmem:[%s755_s1 + $0x30] sm:$0xff]   ;;  %v559_v2 = vld [vmem:[%s755_s1 + $0x28] sm:$0xff]  }
   0x2   :  { %509 = vmatprep.subr.bf16.mxu0 %v557_v0  ;;  %541 = vmatprep.subr.bf16.mxu1 %v557_v0  ;;  %v560_v3 = vld [vmem:[%s755_s1 + $0x20] sm:$0xff]   ;;  %v561_v6 = vld [vmem:[%s755_s1 + $0x18] sm:$0xff]   ;;  %v562_v7 = vld [vmem:[%s755_s1 + $0x10] sm:$0xff]  }
   0x3   :  { %510 = vmatpush3.bf16.msra.mxu0 %v557_v0  ;;  %549 = vmatpush3.bf16.msra.mxu1 %v557_v0  ;;  %v565_v4 = vld [vmem:[%s756_s0] sm:$0xff]   ;;  %v563_v8 = vld [vmem:[%s755_s1 + $0x8] sm:$0xff]   ;;  %v569_v12 = vld [vmem:[%s756_s0 + $0x10] sm:$0xff]  }
   0x4   :  { %511 = vmatprep.subr.bf16.mxu0 %v558_v1  ;;  %542 = vmatprep.subr.bf16.mxu1 %v558_v1  ;;  %v566_v5 = vld [vmem:[%s756_s0 + $0x20] sm:$0xff]   ;;  %v567_v10 = vld [vmem:[%s756_s0 + $0x8] sm:$0xff]   ;;  %v570_v13 = vld [vmem:[%s756_s0 + $0x30] sm:$0xff]  }
   0x5   :  { %525 = vmatprep.mubr.bf16.mxu0 %v565_v4  ;;  %533 = vmatprep.mubr.bf16.mxu1 %v566_v5  ;;  %v564_v9 = vld [vmem:[%s755_s1] sm:$0xff]   ;;  %v568_v11 = vld [vmem:[%s756_s0 + $0x28] sm:$0xff]   ;;  %v571_v14 = vld [vmem:[%s756_s0 + $0x18] sm:$0xff]  }
   0x6   :  { %v572_v15 = vld [vmem:[%s756_s0 + $0x38] sm:$0xff]   ;;  %v486_v16 = vld [vmem:[%s757_s3 + $0x8] sm:$0xff]   ;;  %v655_v18 = vld [vmem:[%s758_s2] ss:$0 sm:$0xff] }
   0x7   :  { %512 = vmatpush3.bf16.msra.mxu0 %v558_v1  ;;  %550 = vmatpush3.bf16.msra.mxu1 %v558_v1  ;;  %v490_v17 = vld [vmem:[%s757_s3 + $0x28] sm:$0xff]   ;;  %v455_v19 = vld [vmem:[%s757_s3] sm:$0xff]   ;;  %v460_v21 = vunpack.c.l.bf16 %v486_v16  ;;  %v670_v35 = vld [vmem:[%s757_s3 + $0x18] sm:$0xff]   ;;  %v461_v38 = vunpack.c.h.bf16 %v486_v16 }
   0x8   :  { %513 = vmatprep.subr.bf16.mxu0 %v559_v2  ;;  %543 = vmatprep.subr.bf16.mxu1 %v559_v2  ;;  %v489_v20 = vld [vmem:[%s757_s3 + $0x20] sm:$0xff]   ;;  %v476_v22 = vunpack.c.l.bf16 %v490_v17  ;;  %v456_v27 = vunpack.c.l.bf16 %v455_v19  ;;  %v675_v36 = vld [vmem:[%s757_s3 + $0x38] sm:$0xff]   ;;  %v477_v40 = vunpack.c.h.bf16 %v490_v17  ;;  %v457_v41 = vunpack.c.h.bf16 %v455_v19  ;;  %v680_v47 = vld [vmem:[%s757_s3 + $0x10] sm:$0xff]  }
   0x9   :  { %v472_v28 = vunpack.c.l.bf16 %v489_v20  ;;  %v473_v42 = vunpack.c.h.bf16 %v489_v20  ;;  %v685_v48 = vld [vmem:[%s757_s3 + $0x30] sm:$0xff]   ;;  %v468_v53 = vunpack.c.l.bf16 %v670_v35  ;;  %v484_v54 = vunpack.c.l.bf16 %v675_v36 }
   0xa   :  { %v464_v63 = vunpack.c.l.bf16 %v680_v47  ;;  %v480_v0 = vunpack.c.l.bf16 %v685_v48  ;;  %v465_v20 = vunpack.c.h.bf16 %v680_v47 }
   0xb   :  { %514 = vmatpush3.bf16.msra.mxu0 %v559_v2  ;;  %551 = vmatpush3.bf16.msra.mxu1 %v559_v2 }
   0xc   :  { %515 = vmatprep.subr.bf16.mxu0 %v560_v3  ;;  %544 = vmatprep.subr.bf16.mxu1 %v560_v3 }
   0xf   :  { %516 = vmatpush3.bf16.msra.mxu0 %v560_v3  ;;  %552 = vmatpush3.bf16.msra.mxu1 %v560_v3 }
  0x10   :  { %517 = vmatprep.subr.bf16.mxu0 %v561_v6  ;;  %545 = vmatprep.subr.bf16.mxu1 %v561_v6 }
  0x13   :  { %518 = vmatpush3.bf16.msra.mxu0 %v561_v6  ;;  %553 = vmatpush3.bf16.msra.mxu1 %v561_v6 }
  0x14   :  { %519 = vmatprep.subr.bf16.mxu0 %v562_v7  ;;  %546 = vmatprep.subr.bf16.mxu1 %v562_v7 }
  0x17   :  { %520 = vmatpush3.bf16.msra.mxu0 %v562_v7  ;;  %554 = vmatpush3.bf16.msra.mxu1 %v562_v7 }
  0x18   :  { %521 = vmatprep.subr.bf16.mxu0 %v563_v8  ;;  %547 = vmatprep.subr.bf16.mxu1 %v563_v8 }
  0x1b   :  { %522 = vmatpush3.bf16.msra.mxu0 %v563_v8  ;;  %555 = vmatpush3.bf16.msra.mxu1 %v563_v8 }
  0x1c   :  { %523 = vmatprep.subr.bf16.mxu0 %v564_v9  ;;  %548 = vmatprep.subr.bf16.mxu1 %v564_v9 }
  0x1f   :  { %524 = vmatpush3.bf16.msra.mxu0 %v564_v9  ;;  %556 = vmatpush3.bf16.msra.mxu1 %v564_v9  ;;  %v469_v9 = vunpack.c.h.bf16 %v670_v35 }
  0x22   :  { %526 = vmatmul.mubr.bf16.vlgmr.msra.gmra.mxu0 %v567_v10  ;;  %534 = vmatmul.mubr.bf16.vlgmr.msra.gmra.mxu1 %v568_v11  ;;  %v485_v10 = vunpack.c.h.bf16 %v675_v36 }
  0x23   :  { %529 = vmatprep.mubr.bf16.mxu0 %v569_v12  ;;  %537 = vmatprep.mubr.bf16.mxu1 %v570_v13 }
  0x2a   :  { %530 = vmatmul.mubr.bf16.gmra.mxu0 %v571_v14  ;;  %538 = vmatmul.mubr.bf16.gmra.mxu1 %v572_v15 }
  0xe2   :  { %v527_v23 = vpop.f32.mrf.mxu0  ;;  %v535_v24 = vpop.f32.mrf.mxu1 }
  0xe3   :  { %v339_v25 = vadd.f32 %v527_v23, %v655_v18  ;;  %v347_v26 = vadd.f32 %v535_v24, %v655_v18 }
  0xe4   :  { %v216_v29 = vpop.f32.mrf.mxu0  ;;  %v248_v30 = vpop.f32.mrf.mxu1 }
  0xe5   :  { %v387_v31 = vadd.f32 %v460_v21, %v339_v25  ;;  %v395_v32 = vadd.f32 %v476_v22, %v347_v26  ;;  %v337_v33 = vadd.f32 %v655_v18, %v216_v29  ;;  %v345_v34 = vadd.f32 %v655_v18, %v248_v30 }
  0xe6   :  { %v528_v37 = vpop.f32.mrf.mxu0  ;;  %v536_v39 = vpop.f32.mrf.mxu1  ;;  %v481_v21 = vunpack.c.h.bf16 %v685_v48 }
  0xe7   :  { %v403_v43 = vmax.f32 %v387_v31, 0.0  ;;  %v411_v44 = vmax.f32 %v395_v32, 0.0  ;;  %v385_v45 = vadd.f32 %v456_v27, %v337_v33  ;;  %v393_v46 = vadd.f32 %v472_v28, %v345_v34 }
  0xe8   :  { %v340_v49 = vadd.f32 %v528_v37, %v655_v18  ;;  %v348_v50 = vadd.f32 %v536_v39, %v655_v18  ;;  %v219_v51 = vpop.f32.mrf.mxu0  ;;  %v251_v52 = vpop.f32.mrf.mxu1 }
  0xe9   :  { %419 = vst [vmem:[%s759_s4 + $0x10] sm:$0xff] %v403_v43  ;;  %427 = vst [vmem:[%s759_s4 + $0x50] sm:$0xff] %v411_v44  ;;  %v401_v55 = vmax.f32 %v385_v45, 0.0  ;;  %v409_v56 = vmax.f32 %v393_v46, 0.0  ;;  %v338_v57 = vadd.f32 %v655_v18, %v219_v51  ;;  %v346_v58 = vadd.f32 %v655_v18, %v251_v52 }
  0xea   :  { %v388_v59 = vadd.f32 %v461_v38, %v340_v49  ;;  %v396_v60 = vadd.f32 %v477_v40, %v348_v50  ;;  %v531_v61 = vpop.f32.mrf.mxu0  ;;  %v539_v62 = vpop.f32.mrf.mxu1 }
  0xeb   :  { %417 = vst [vmem:[%s759_s4] sm:$0xff] %v401_v55  ;;  %425 = vst [vmem:[%s759_s4 + $0x40] sm:$0xff] %v409_v56  ;;  %v386_v1 = vadd.f32 %v457_v41, %v338_v57  ;;  %v394_v2 = vadd.f32 %v473_v42, %v346_v58  ;;  %v343_v3 = vadd.f32 %v531_v61, %v655_v18 }
  0xec   :  { %v351_v4 = vadd.f32 %v539_v62, %v655_v18  ;;  %v404_v5 = vmax.f32 %v388_v59, 0.0  ;;  %v412_v6 = vmax.f32 %v396_v60, 0.0  ;;  %v232_v7 = vpop.f32.mrf.mxu0  ;;  %v264_v8 = vpop.f32.mrf.mxu1 }
  0xed   :  { %v402_v11 = vmax.f32 %v386_v1, 0.0  ;;  %v410_v12 = vmax.f32 %v394_v2, 0.0  ;;  %v391_v13 = vadd.f32 %v468_v53, %v343_v3  ;;  %v341_v15 = vadd.f32 %v655_v18, %v232_v7 }
  0xee   :  { %v399_v14 = vadd.f32 %v484_v54, %v351_v4  ;;  %420 = vst [vmem:[%s759_s4 + $0x18] sm:$0xff] %v404_v5  ;;  %428 = vst [vmem:[%s759_s4 + $0x58] sm:$0xff] %v412_v6  ;;  %v349_v16 = vadd.f32 %v655_v18, %v264_v8  ;;  %v532_v17 = vpop.f32.mrf.mxu0  ;;  %v540_v19 = vpop.f32.mrf.mxu1 }
  0xef   :  { %418 = vst [vmem:[%s759_s4 + $0x8] sm:$0xff] %v402_v11  ;;  %426 = vst [vmem:[%s759_s4 + $0x48] sm:$0xff] %v410_v12  ;;  %v407_v22 = vmax.f32 %v391_v13, 0.0  ;;  %v344_v24 = vadd.f32 %v532_v17, %v655_v18  ;;  %v352_v25 = vadd.f32 %v540_v19, %v655_v18  ;;  %v389_v26 = vadd.f32 %v464_v63, %v341_v15 }
  0xf0   :  { %v415_v23 = vmax.f32 %v399_v14, 0.0  ;;  %v397_v27 = vadd.f32 %v480_v0, %v349_v16  ;;  %v235_v28 = vpop.f32.mrf.mxu0  ;;  %v267_v29 = vpop.f32.mrf.mxu1 }
  0xf1   :  { %423 = vst [vmem:[%s759_s4 + $0x30] sm:$0xff] %v407_v22  ;;  %v392_v30 = vadd.f32 %v469_v9, %v344_v24  ;;  %v400_v31 = vadd.f32 %v485_v10, %v352_v25  ;;  %v342_v32 = vadd.f32 %v655_v18, %v235_v28  ;;  %v350_v33 = vadd.f32 %v655_v18, %v267_v29 }
  0xf2   :  { %431 = vst [vmem:[%s759_s4 + $0x70] sm:$0xff] %v415_v23  ;;  %v405_v34 = vmax.f32 %v389_v26, 0.0  ;;  %v413_v35 = vmax.f32 %v397_v27, 0.0 }
  0xf3   :  { %v408_v36 = vmax.f32 %v392_v30, 0.0  ;;  %v416_v37 = vmax.f32 %v400_v31, 0.0  ;;  %v390_v38 = vadd.f32 %v465_v20, %v342_v32  ;;  %v398_v39 = vadd.f32 %v481_v21, %v350_v33 }
  0xf4   :  { %421 = vst [vmem:[%s759_s4 + $0x20] sm:$0xff] %v405_v34  ;;  %429 = vst [vmem:[%s759_s4 + $0x60] sm:$0xff] %v413_v35 }
  0xf5   :  { %424 = vst [vmem:[%s759_s4 + $0x38] sm:$0xff] %v408_v36  ;;  %432 = vst [vmem:[%s759_s4 + $0x78] sm:$0xff] %v416_v37  ;;  %v406_v18 = vmax.f32 %v390_v38, 0.0  ;;  %v414_v40 = vmax.f32 %v398_v39, 0.0 }
  0xf7   :  { %422 = vst [vmem:[%s759_s4 + $0x28] sm:$0xff] %v406_v18  ;;  %430 = vst [vmem:[%s759_s4 + $0x68] sm:$0xff] %v414_v40 }

</bundles_post_ra>
